<compile_context>
chip_gen: v5e
topology: v5e:2x2
jax: 0.10.0
libtpu: 0.0.40
codegen_flags: <defaults>
</compile_context>

<pallas_src>
import math

import jax
import jax.numpy as jnp
from jax import lax
from jax.experimental import pallas as pl
from jax.experimental.pallas import tpu as pltpu

LN_EPS = 1e-5  # PyTorch nn.LayerNorm default


# ---------------------------------------------------------------------------
# In-kernel math helpers (traced inside the Pallas kernel body)
# ---------------------------------------------------------------------------
def _erf(x):
    # Abramowitz & Stegun 7.1.26 polynomial (|err| < 1.5e-7): lets the exact
    # (erf-based) PyTorch GELU lower cleanly onto the TPU VPU/EUP.
    a1, a2, a3, a4, a5 = (0.254829592, -0.284496736, 1.421413741,
                          -1.453152027, 1.061405429)
    p = 0.3275911
    s = jnp.where(x >= 0.0, 1.0, -1.0)
    ax = jnp.abs(x)
    t = pl.reciprocal(1.0 + p * ax, approx=True)   # EUP reciprocal (free slot)
    poly = ((((a5 * t + a4) * t + a3) * t + a2) * t + a1) * t
    return s * (1.0 - poly * jnp.exp(-ax * ax))


def _gelu_exact(x):
    return 0.5 * x * (1.0 + _erf(x * (1.0 / math.sqrt(2.0))))


def _layernorm(x, gamma, beta):
    mu = jnp.mean(x, axis=-1, keepdims=True)
    xc = x - mu
    var = jnp.mean(xc * xc, axis=-1, keepdims=True)
    return xc * lax.rsqrt(var + LN_EPS) * gamma + beta


# ---------------------------------------------------------------------------
# Kernel: grid = (batch, q-tile).  QKV for the whole sequence of one batch
# element is computed once (tile 0) and kept resident in VMEM scratch.
# ---------------------------------------------------------------------------
def _encoder_block_kernel(x_ref, ln1_g_ref, ln1_b_ref,
                          wqkv_ref, bqkv_ref, wo_ref, bo_ref,
                          ln2_g_ref, ln2_b_ref,
                          w1_ref, b1_ref, w2_ref, b2_ref,
                          o_ref,
                          q_sc, k_sc, v_sc):
    t = pl.program_id(1)
    _, L, E = x_ref.shape
    TL = o_ref.shape[1]
    H, _, Dh = k_sc.shape
    scale = 1.0 / math.sqrt(Dh)
    bf16 = jnp.bfloat16

    # Hoisted parameter loads (no repeated broadcasts).
    g1 = ln1_g_ref[...]
    b1n = ln1_b_ref[...]

    # ---- once per batch element: fused QKV projection of the full sequence,
    #      stored head-major (H, L, Dh) in bf16 VMEM scratch.
    @pl.when(t == 0)
    def _():
        x_full = x_ref[0].astype(jnp.float32)                       # (L, E)
        xn = _layernorm(x_full, g1, b1n).astype(bf16)
        qkv = jnp.dot(xn, wqkv_ref[...],
                      preferred_element_type=jnp.float32) + bqkv_ref[...]
        # Static E-aligned lane slices (128-aligned for realistic E), then
        # split features into heads and move to head-major layout in f32.
        q = (qkv[:, 0 * E:1 * E] * scale).reshape(L, H, Dh)
        k = qkv[:, 1 * E:2 * E].reshape(L, H, Dh)
        v = qkv[:, 2 * E:3 * E].reshape(L, H, Dh)
        q_sc[...] = jnp.transpose(q, (1, 0, 2)).astype(bf16)        # (H, L, Dh)
        k_sc[...] = jnp.transpose(k, (1, 0, 2)).astype(bf16)
        v_sc[...] = jnp.transpose(v, (1, 0, 2)).astype(bf16)

    # ---- per q-tile attention against resident K/V (all heads batched) ----
    row0 = pl.multiple_of(t * TL, TL)
    x_t = x_ref[0, pl.ds(row0, TL), :].astype(jnp.float32)          # (TL, E)
    q3 = q_sc[:, pl.ds(row0, TL), :]                                # (H, TL, Dh)

    s = jnp.einsum('htd,hld->htl', q3, k_sc[...],
                   preferred_element_type=jnp.float32)              # (H, TL, L)
    s = s - jnp.max(s, axis=-1, keepdims=True)
    p = jnp.exp(s)
    p = p * pl.reciprocal(jnp.sum(p, axis=-1, keepdims=True), approx=True)
    ctx = jnp.einsum('htl,hld->htd', p.astype(bf16), v_sc[...],
                     preferred_element_type=jnp.float32)            # (H, TL, Dh)
    ctx = jnp.transpose(ctx, (1, 0, 2)).reshape(TL, E)               # (TL, E)

    attn = jnp.dot(ctx.astype(bf16), wo_ref[...],
                   preferred_element_type=jnp.float32) + bo_ref[...]
    x1 = x_t + attn                                # attn_dropout == identity (eval)

    # ---- pre-norm MLP ----
    xn2 = _layernorm(x1, ln2_g_ref[...], ln2_b_ref[...]).astype(bf16)
    h1 = jnp.dot(xn2, w1_ref[...],
                 preferred_element_type=jnp.float32) + b1_ref[...]
    h1 = _gelu_exact(h1).astype(bf16)
    h2 = jnp.dot(h1, w2_ref[...],
                 preferred_element_type=jnp.float32) + b2_ref[...]
    o_ref[0] = (x1 + h2).astype(o_ref.dtype)       # mlp dropouts == identity (eval)


# ---------------------------------------------------------------------------
# Wrapper
# ---------------------------------------------------------------------------
def transformer_encoder_block(x, params, num_heads, q_tile=256):
    B, L, E = x.shape
    hidden = params["w1"].shape[1]
    assert E % num_heads == 0, "embed_dim must be divisible by num_heads"
    Dh = E // num_heads

    TL = min(q_tile, L)
    if L % TL != 0:
        TL = L                          # fall back to one tile per sequence
    assert TL == L or TL % 8 == 0, "q tile must be a multiple of 8 sublanes"
    T = L // TL

    f32, bf16 = jnp.float32, jnp.bfloat16
    # bf16 weights feed the MXU directly and halve HBM->VMEM traffic;
    # biases / LayerNorm params stay f32 (added in f32 inside the kernel).
    wqkv = params["wqkv"].astype(bf16)
    wo = params["wo"].astype(bf16)
    w1 = params["w1"].astype(bf16)
    w2 = params["w2"].astype(bf16)

    def rep(shape):                     # broadcast (constant-index) operand
        return pl.BlockSpec(shape, lambda b, t: (0,) * len(shape))

    in_specs = [
        pl.BlockSpec((1, L, E), lambda b, t: (b, 0, 0)),  # x: full seq of batch b
        rep((1, E)), rep((1, E)),                         # ln1 gamma / beta
        rep((E, 3 * E)), rep((1, 3 * E)),                 # fused qkv proj
        rep((E, E)), rep((1, E)),                         # out proj
        rep((1, E)), rep((1, E)),                         # ln2 gamma / beta
        rep((E, hidden)), rep((1, hidden)),               # mlp fc1
        rep((hidden, E)), rep((1, E)),                    # mlp fc2
    ]
    out_spec = pl.BlockSpec((1, TL, E), lambda b, t: (b, t, 0))

    scratch_shapes = [
        pltpu.VMEM((num_heads, L, Dh), bf16),   # Q (pre-scaled, head-major)
        pltpu.VMEM((num_heads, L, Dh), bf16),   # K
        pltpu.VMEM((num_heads, L, Dh), bf16),   # V
    ]

    # VMEM budget: raise the scoped limit only when the (double-buffered)
    # resident weights + scratch outgrow the 16/32 MiB defaults.
    # TODO(synk): for very large E on v7x (64 MiB VMEM), stream w1/w2 K-chunks
    # from HBM via pltpu.emit_pipeline instead of keeping them fully resident.
    weight_bytes = 2 * (3 * E * E + E * E + 2 * E * hidden)          # bf16
    bias_bytes = 4 * (3 * E + 6 * E + hidden)
    est = (2 * (weight_bytes + bias_bytes + 4 * L * E)               # dbl-buffered in
           + 2 * 4 * TL * E                                          # dbl-buffered out
           + 3 * 2 * num_heads * L * Dh                              # q/k/v scratch
           + 4 * (3 * L * E + TL * hidden + num_heads * TL * L)      # live activations
           + (2 << 20))
    vmem_limit = int(min(est, 100 * 1024 * 1024)) if est > (32 << 20) else None

    return pl.pallas_call(
        _encoder_block_kernel,
        out_shape=jax.ShapeDtypeStruct((B, L, E), x.dtype),
        grid=(B, T),
        in_specs=in_specs,
        out_specs=out_spec,
        scratch_shapes=scratch_shapes,
        compiler_params=pltpu.CompilerParams(
            dimension_semantics=("parallel", "arbitrary"),
            vmem_limit_bytes=vmem_limit),
    )(x,
      params["ln1_g"].astype(f32), params["ln1_b"].astype(f32),
      wqkv, params["bqkv"].astype(f32),
      wo, params["bo"].astype(f32),
      params["ln2_g"].astype(f32), params["ln2_b"].astype(f32),
      w1, params["b1"].astype(f32),
      w2, params["b2"].astype(f32))


# ---------------------------------------------------------------------------
# Pure-JAX f32 reference (for correctness check)
# ---------------------------------------------------------------------------
def reference(x, p, num_heads):
    def ln(t, g, b):
        mu = t.mean(-1, keepdims=True)
        var = ((t - mu) ** 2).mean(-1, keepdims=True)
        return (t - mu) / jnp.sqrt(var + LN_EPS) * g + b

    B, L, E = x.shape
    Dh = E // num_heads
    xn = ln(x, p["ln1_g"][0], p["ln1_b"][0])
    qkv = xn @ p["wqkv"] + p["bqkv"][0]
    q, k, v = jnp.split(qkv, 3, axis=-1)
    q = q.reshape(B, L, num_heads, Dh).transpose(0, 2, 1, 3)
    k = k.reshape(B, L, num_heads, Dh).transpose(0, 2, 1, 3)
    v = v.reshape(B, L, num_heads, Dh).transpose(0, 2, 1, 3)
    s = (q @ k.transpose(0, 1, 3, 2)) / math.sqrt(Dh)
    a = jax.nn.softmax(s, axis=-1)
    ctx = (a @ v).transpose(0, 2, 1, 3).reshape(B, L, E)
    x = x + (ctx @ p["wo"] + p["bo"][0])
    xn2 = ln(x, p["ln2_g"][0], p["ln2_b"][0])
    h = jax.nn.gelu(xn2 @ p["w1"] + p["b1"][0], approximate=False)
    return x + (h @ p["w2"] + p["b2"][0])


# ---------------------------------------------------------------------------
def make_params(key, embed_dim, mlp_ratio):
    hidden = int(embed_dim * mlp_ratio)
    ks = jax.random.split(key, 8)
    std = 0.02
    return {
        "ln1_g": jnp.ones((1, embed_dim), jnp.float32),
        "ln1_b": jnp.zeros((1, embed_dim), jnp.float32),
        "wqkv": std * jax.random.normal(ks[0], (embed_dim, 3 * embed_dim), jnp.float32),
        "bqkv": std * jax.random.normal(ks[1], (1, 3 * embed_dim), jnp.float32),
        "wo":   std * jax.random.normal(ks[2], (embed_dim, embed_dim), jnp.float32),
        "bo":   std * jax.random.normal(ks[3], (1, embed_dim), jnp.float32),
        "ln2_g": jnp.ones((1, embed_dim), jnp.float32),
        "ln2_b": jnp.zeros((1, embed_dim), jnp.float32),
        "w1":   std * jax.random.normal(ks[4], (embed_dim, hidden), jnp.float32),
        "b1":   std * jax.random.normal(ks[5], (1, hidden), jnp.float32),
        "w2":   std * jax.random.normal(ks[6], (hidden, embed_dim), jnp.float32),
        "b2":   std * jax.random.normal(ks[7], (1, embed_dim), jnp.float32),
    }


if __name__ == "__main__":
    B, L, E = 2, 16, 32
    num_heads, mlp_ratio = 4, 4.0

    key = jax.random.PRNGKey(0)
    kx, kp = jax.random.split(key)
    x = jax.random.normal(kx, (B, L, E), jnp.float32)
    params = make_params(kp, E, mlp_ratio)

    ref = jax.block_until_ready(reference(x, params, num_heads))

    # Exercise both the multi-tile path (grid = (B, L // 8)) and single-tile path.
    for q_tile in (8, L):
        out = jax.block_until_ready(
            transformer_encoder_block(x, params, num_heads, q_tile=q_tile))
        assert out.shape == (B, L, E)
        # bf16 MXU operands + approx reciprocal -> compare with loose tolerance;
        # LayerNorm / softmax stats / residuals are kept in f32 inside the kernel.
        assert jnp.allclose(out, ref, rtol=2e-2, atol=2e-2), \
            f"mismatch vs reference (q_tile={q_tile})"

    print("KERNEL_OK")
</pallas_src>

<mosaic_0001>
module attributes {stable_mosaic.version = 11 : i64} {
  func.func @_encoder_block_kernel(%arg0: i32, %arg1: i32, %arg2: memref<1x16x32xf32, #tpu.memory_space<vmem>>, %arg3: memref<1x32xf32, #tpu.memory_space<vmem>>, %arg4: memref<1x32xf32, #tpu.memory_space<vmem>>, %arg5: memref<32x96xbf16, #tpu.memory_space<vmem>>, %arg6: memref<1x96xf32, #tpu.memory_space<vmem>>, %arg7: memref<32x32xbf16, #tpu.memory_space<vmem>>, %arg8: memref<1x32xf32, #tpu.memory_space<vmem>>, %arg9: memref<1x32xf32, #tpu.memory_space<vmem>>, %arg10: memref<1x32xf32, #tpu.memory_space<vmem>>, %arg11: memref<32x128xbf16, #tpu.memory_space<vmem>>, %arg12: memref<1x128xf32, #tpu.memory_space<vmem>>, %arg13: memref<128x32xbf16, #tpu.memory_space<vmem>>, %arg14: memref<1x32xf32, #tpu.memory_space<vmem>>, %arg15: memref<1x8x32xf32, #tpu.memory_space<vmem>>, %arg16: memref<4x16x8xbf16, #tpu.memory_space<vmem>>, %arg17: memref<4x16x8xbf16, #tpu.memory_space<vmem>>, %arg18: memref<4x16x8xbf16, #tpu.memory_space<vmem>>) attributes {dimension_semantics = [#tpu.dimension_semantics<parallel>, #tpu.dimension_semantics<arbitrary>], iteration_bounds = array<i64: 2, 2>, scalar_prefetch = 0 : i64, scratch_operands = 3 : i64, tpu.core_type = #tpu.core_type<tc>, window_params = [{transform_indices = @transform_0, window_bounds = array<i64: 1, 16, 32>}, {pipeline_mode = #tpu.pipeline_mode<synchronous>, transform_indices = @transform_1, window_bounds = array<i64: 1, 32>}, {pipeline_mode = #tpu.pipeline_mode<synchronous>, transform_indices = @transform_2, window_bounds = array<i64: 1, 32>}, {pipeline_mode = #tpu.pipeline_mode<synchronous>, transform_indices = @transform_3, window_bounds = array<i64: 32, 96>}, {pipeline_mode = #tpu.pipeline_mode<synchronous>, transform_indices = @transform_4, window_bounds = array<i64: 1, 96>}, {pipeline_mode = #tpu.pipeline_mode<synchronous>, transform_indices = @transform_5, window_bounds = array<i64: 32, 32>}, {pipeline_mode = #tpu.pipeline_mode<synchronous>, transform_indices = @transform_6, window_bounds = array<i64: 1, 32>}, {pipeline_mode = #tpu.pipeline_mode<synchronous>, transform_indices = @transform_7, window_bounds = array<i64: 1, 32>}, {pipeline_mode = #tpu.pipeline_mode<synchronous>, transform_indices = @transform_8, window_bounds = array<i64: 1, 32>}, {pipeline_mode = #tpu.pipeline_mode<synchronous>, transform_indices = @transform_9, window_bounds = array<i64: 32, 128>}, {pipeline_mode = #tpu.pipeline_mode<synchronous>, transform_indices = @transform_10, window_bounds = array<i64: 1, 128>}, {pipeline_mode = #tpu.pipeline_mode<synchronous>, transform_indices = @transform_11, window_bounds = array<i64: 128, 32>}, {pipeline_mode = #tpu.pipeline_mode<synchronous>, transform_indices = @transform_12, window_bounds = array<i64: 1, 32>}, {transform_indices = @transform_13, window_bounds = array<i64: 1, 8, 32>}]} {
    %c0 = arith.constant 0 : index
    %c0_0 = arith.constant 0 : index
    %0 = vector.load %arg3[%c0, %c0_0] : memref<1x32xf32, #tpu.memory_space<vmem>>, vector<1x32xf32>
    %c0_1 = arith.constant 0 : index
    %c0_2 = arith.constant 0 : index
    %1 = vector.load %arg4[%c0_1, %c0_2] : memref<1x32xf32, #tpu.memory_space<vmem>>, vector<1x32xf32>
    %c0_i32 = arith.constant 0 : i32
    %2 = arith.cmpi eq, %arg1, %c0_i32 : i32
    %3 = arith.extui %2 : i1 to i32
    %c0_i32_3 = arith.constant 0 : i32
    %4 = arith.cmpi ne, %3, %c0_i32_3 : i32
    scf.if %4 {
      %c0_59 = arith.constant 0 : index
      %c0_60 = arith.constant 0 : index
      %c0_61 = arith.constant 0 : index
      %114 = vector.load %arg2[%c0_59, %c0_60, %c0_61] : memref<1x16x32xf32, #tpu.memory_space<vmem>>, vector<1x16x32xf32>
      %115 = vector.shape_cast %114 : vector<1x16x32xf32> to vector<16x32xf32>
      %cst_62 = arith.constant dense<0.000000e+00> : vector<16xf32>
      %116 = vector.multi_reduction <add>, %115, %cst_62 [1] : vector<16x32xf32> to vector<16xf32>
      %117 = vector.shape_cast %116 : vector<16xf32> to vector<16x1xf32>
      %cst_63 = arith.constant 3.200000e+01 : f32
      %118 = vector.broadcast %cst_63 : f32 to vector<16x1xf32>
      %119 = arith.divf %117, %118 : vector<16x1xf32>
      %120 = vector.broadcast %119 : vector<16x1xf32> to vector<16x32xf32>
      %121 = arith.subf %115, %120 : vector<16x32xf32>
      %122 = arith.mulf %121, %121 : vector<16x32xf32>
      %cst_64 = arith.constant dense<0.000000e+00> : vector<16xf32>
      %123 = vector.multi_reduction <add>, %122, %cst_64 [1] : vector<16x32xf32> to vector<16xf32>
      %124 = vector.shape_cast %123 : vector<16xf32> to vector<16x1xf32>
      %cst_65 = arith.constant 3.200000e+01 : f32
      %125 = vector.broadcast %cst_65 : f32 to vector<16x1xf32>
      %126 = arith.divf %124, %125 : vector<16x1xf32>
      %cst_66 = arith.constant 9.99999974E-6 : f32
      %127 = vector.broadcast %cst_66 : f32 to vector<16x1xf32>
      %128 = arith.addf %126, %127 : vector<16x1xf32>
      %129 = math.rsqrt %128 : vector<16x1xf32>
      %130 = vector.broadcast %129 : vector<16x1xf32> to vector<16x32xf32>
      %131 = arith.mulf %121, %130 : vector<16x32xf32>
      %132 = vector.broadcast %0 : vector<1x32xf32> to vector<16x32xf32>
      %133 = arith.mulf %131, %132 : vector<16x32xf32>
      %134 = vector.broadcast %1 : vector<1x32xf32> to vector<16x32xf32>
      %135 = arith.addf %133, %134 : vector<16x32xf32>
      %136 = arith.truncf %135 : vector<16x32xf32> to vector<16x32xbf16>
      %c0_67 = arith.constant 0 : index
      %c0_68 = arith.constant 0 : index
      %137 = vector.load %arg5[%c0_67, %c0_68] : memref<32x96xbf16, #tpu.memory_space<vmem>>, vector<32x96xbf16>
      %cst_69 = arith.constant dense<0.000000e+00> : vector<16x96xf32>
      %138 = tpu.matmul %136, %137, %cst_69 {dimension_numbers = #tpu.dot_dimension_numbers<[1], [0], [0], [1], [0, 0, 1, 1], [], []>} : vector<16x32xbf16>, vector<32x96xbf16>, vector<16x96xf32> -> vector<16x96xf32>
      %c0_70 = arith.constant 0 : index
      %c0_71 = arith.constant 0 : index
      %139 = vector.load %arg6[%c0_70, %c0_71] : memref<1x96xf32, #tpu.memory_space<vmem>>, vector<1x96xf32>
      %140 = vector.broadcast %139 : vector<1x96xf32> to vector<16x96xf32>
      %141 = arith.addf %138, %140 : vector<16x96xf32>
      %142 = vector.extract_strided_slice %141 {offsets = [0, 0], sizes = [16, 32], strides = [1, 1]} : vector<16x96xf32> to vector<16x32xf32>
      %cst_72 = arith.constant 0.353553385 : f32
      %143 = vector.broadcast %cst_72 : f32 to vector<16x32xf32>
      %144 = arith.mulf %142, %143 : vector<16x32xf32>
      %145 = vector.shape_cast %144 : vector<16x32xf32> to vector<16x4x8xf32>
      %146 = vector.extract_strided_slice %141 {offsets = [0, 32], sizes = [16, 32], strides = [1, 1]} : vector<16x96xf32> to vector<16x32xf32>
      %147 = vector.shape_cast %146 : vector<16x32xf32> to vector<16x4x8xf32>
      %148 = vector.extract_strided_slice %141 {offsets = [0, 64], sizes = [16, 32], strides = [1, 1]} : vector<16x96xf32> to vector<16x32xf32>
      %149 = vector.shape_cast %148 : vector<16x32xf32> to vector<16x4x8xf32>
      %150 = tpu.transpose %145, [1, 0, 2] : vector<16x4x8xf32> -> vector<4x16x8xf32>
      %151 = arith.truncf %150 : vector<4x16x8xf32> to vector<4x16x8xbf16>
      %c0_73 = arith.constant 0 : index
      %c0_74 = arith.constant 0 : index
      %c0_75 = arith.constant 0 : index
      %152 = vector.load %arg16[%c0_73, %c0_74, %c0_75] : memref<4x16x8xbf16, #tpu.memory_space<vmem>>, vector<4x16x8xbf16>
      tpu.vector_store %arg16[%c0_73, %c0_74, %c0_75], %151 {strides = array<i32>} : memref<4x16x8xbf16, #tpu.memory_space<vmem>>, vector<4x16x8xbf16>,
      %153 = tpu.transpose %147, [1, 0, 2] : vector<16x4x8xf32> -> vector<4x16x8xf32>
      %154 = arith.truncf %153 : vector<4x16x8xf32> to vector<4x16x8xbf16>
      %c0_76 = arith.constant 0 : index
      %c0_77 = arith.constant 0 : index
      %c0_78 = arith.constant 0 : index
      %155 = vector.load %arg17[%c0_76, %c0_77, %c0_78] : memref<4x16x8xbf16, #tpu.memory_space<vmem>>, vector<4x16x8xbf16>
      tpu.vector_store %arg17[%c0_76, %c0_77, %c0_78], %154 {strides = array<i32>} : memref<4x16x8xbf16, #tpu.memory_space<vmem>>, vector<4x16x8xbf16>,
      %156 = tpu.transpose %149, [1, 0, 2] : vector<16x4x8xf32> -> vector<4x16x8xf32>
      %157 = arith.truncf %156 : vector<4x16x8xf32> to vector<4x16x8xbf16>
      %c0_79 = arith.constant 0 : index
      %c0_80 = arith.constant 0 : index
      %c0_81 = arith.constant 0 : index
      %158 = vector.load %arg18[%c0_79, %c0_80, %c0_81] : memref<4x16x8xbf16, #tpu.memory_space<vmem>>, vector<4x16x8xbf16>
      tpu.vector_store %arg18[%c0_79, %c0_80, %c0_81], %157 {strides = array<i32>} : memref<4x16x8xbf16, #tpu.memory_space<vmem>>, vector<4x16x8xbf16>,
    } else {
    }
    %c8_i32 = arith.constant 8 : i32
    %5 = arith.muli %arg1, %c8_i32 : i32
    %6 = tpu.assume_multiple %5, 8 : i32
    %c0_4 = arith.constant 0 : index
    %7 = arith.index_cast %6 : i32 to index
    %c0_5 = arith.constant 0 : index
    %8 = vector.load %arg2[%c0_4, %7, %c0_5] : memref<1x16x32xf32, #tpu.memory_space<vmem>>, vector<1x8x32xf32>
    %9 = vector.shape_cast %8 : vector<1x8x32xf32> to vector<8x32xf32>
    %c0_6 = arith.constant 0 : index
    %10 = arith.index_cast %6 : i32 to index
    %c0_7 = arith.constant 0 : index
    %11 = vector.load %arg16[%c0_6, %10, %c0_7] : memref<4x16x8xbf16, #tpu.memory_space<vmem>>, vector<4x8x8xbf16>
    %c0_8 = arith.constant 0 : index
    %c0_9 = arith.constant 0 : index
    %c0_10 = arith.constant 0 : index
    %12 = vector.load %arg17[%c0_8, %c0_9, %c0_10] : memref<4x16x8xbf16, #tpu.memory_space<vmem>>, vector<4x16x8xbf16>
    "tpu.trace_start"() <{level = 10 : i32, message = "htd,hld->htl"}> : () -> ()
    %cst = arith.constant dense<0.000000e+00> : vector<4x8x16xf32>
    %13 = tpu.matmul %11, %12, %cst {dimension_numbers = #tpu.dot_dimension_numbers<[2], [2], [1], [1], [0, 0, 0, 1, 1, 1], [0], [0]>} : vector<4x8x8xbf16>, vector<4x16x8xbf16>, vector<4x8x16xf32> -> vector<4x8x16xf32>
    "tpu.trace_stop"() : () -> ()
    %cst_11 = arith.constant dense<0xFF800000> : vector<4x8xf32>
    %14 = vector.multi_reduction <maximumf>, %13, %cst_11 [2] : vector<4x8x16xf32> to vector<4x8xf32>
    %15 = vector.shape_cast %14 : vector<4x8xf32> to vector<4x8x1xf32>
    %16 = vector.broadcast %15 : vector<4x8x1xf32> to vector<4x8x16xf32>
    %17 = arith.subf %13, %16 : vector<4x8x16xf32>
    %18 = math.exp %17 : vector<4x8x16xf32>
    %cst_12 = arith.constant dense<0.000000e+00> : vector<4x8xf32>
    %19 = vector.multi_reduction <add>, %18, %cst_12 [2] : vector<4x8x16xf32> to vector<4x8xf32>
    %20 = vector.shape_cast %19 : vector<4x8xf32> to vector<4x8x1xf32>
    %21 = tpu.reciprocal %20 {approx = true} : vector<4x8x1xf32> -> vector<4x8x1xf32>
    %22 = vector.broadcast %21 : vector<4x8x1xf32> to vector<4x8x16xf32>
    %23 = arith.mulf %18, %22 : vector<4x8x16xf32>
    %24 = arith.truncf %23 : vector<4x8x16xf32> to vector<4x8x16xbf16>
    %c0_13 = arith.constant 0 : index
    %c0_14 = arith.constant 0 : index
    %c0_15 = arith.constant 0 : index
    %25 = vector.load %arg18[%c0_13, %c0_14, %c0_15] : memref<4x16x8xbf16, #tpu.memory_space<vmem>>, vector<4x16x8xbf16>
    "tpu.trace_start"() <{level = 10 : i32, message = "htl,hld->htd"}> : () -> ()
    %cst_16 = arith.constant dense<0.000000e+00> : vector<4x8x8xf32>
    %26 = tpu.matmul %24, %25, %cst_16 {dimension_numbers = #tpu.dot_dimension_numbers<[2], [1], [1], [2], [0, 0, 0, 1, 1, 2], [0], [0]>} : vector<4x8x16xbf16>, vector<4x16x8xbf16>, vector<4x8x8xf32> -> vector<4x8x8xf32>
    "tpu.trace_stop"() : () -> ()
    %27 = tpu.transpose %26, [1, 0, 2] : vector<4x8x8xf32> -> vector<8x4x8xf32>
    %28 = vector.shape_cast %27 : vector<8x4x8xf32> to vector<8x32xf32>
    %29 = arith.truncf %28 : vector<8x32xf32> to vector<8x32xbf16>
    %c0_17 = arith.constant 0 : index
    %c0_18 = arith.constant 0 : index
    %30 = vector.load %arg7[%c0_17, %c0_18] : memref<32x32xbf16, #tpu.memory_space<vmem>>, vector<32x32xbf16>
    %cst_19 = arith.constant dense<0.000000e+00> : vector<8x32xf32>
    %31 = tpu.matmul %29, %30, %cst_19 {dimension_numbers = #tpu.dot_dimension_numbers<[1], [0], [0], [1], [0, 0, 1, 1], [], []>} : vector<8x32xbf16>, vector<32x32xbf16>, vector<8x32xf32> -> vector<8x32xf32>
    %c0_20 = arith.constant 0 : index
    %c0_21 = arith.constant 0 : index
    %32 = vector.load %arg8[%c0_20, %c0_21] : memref<1x32xf32, #tpu.memory_space<vmem>>, vector<1x32xf32>
    %33 = vector.broadcast %32 : vector<1x32xf32> to vector<8x32xf32>
    %34 = arith.addf %31, %33 : vector<8x32xf32>
    %35 = arith.addf %9, %34 : vector<8x32xf32>
    %c0_22 = arith.constant 0 : index
    %c0_23 = arith.constant 0 : index
    %36 = vector.load %arg9[%c0_22, %c0_23] : memref<1x32xf32, #tpu.memory_space<vmem>>, vector<1x32xf32>
    %c0_24 = arith.constant 0 : index
    %c0_25 = arith.constant 0 : index
    %37 = vector.load %arg10[%c0_24, %c0_25] : memref<1x32xf32, #tpu.memory_space<vmem>>, vector<1x32xf32>
    %cst_26 = arith.constant dense<0.000000e+00> : vector<8xf32>
    %38 = vector.multi_reduction <add>, %35, %cst_26 [1] : vector<8x32xf32> to vector<8xf32>
    %39 = vector.shape_cast %38 : vector<8xf32> to vector<8x1xf32>
    %cst_27 = arith.constant 3.200000e+01 : f32
    %40 = vector.broadcast %cst_27 : f32 to vector<8x1xf32>
    %41 = arith.divf %39, %40 : vector<8x1xf32>
    %42 = vector.broadcast %41 : vector<8x1xf32> to vector<8x32xf32>
    %43 = arith.subf %35, %42 : vector<8x32xf32>
    %44 = arith.mulf %43, %43 : vector<8x32xf32>
    %cst_28 = arith.constant dense<0.000000e+00> : vector<8xf32>
    %45 = vector.multi_reduction <add>, %44, %cst_28 [1] : vector<8x32xf32> to vector<8xf32>
    %46 = vector.shape_cast %45 : vector<8xf32> to vector<8x1xf32>
    %cst_29 = arith.constant 3.200000e+01 : f32
    %47 = vector.broadcast %cst_29 : f32 to vector<8x1xf32>
    %48 = arith.divf %46, %47 : vector<8x1xf32>
    %cst_30 = arith.constant 9.99999974E-6 : f32
    %49 = vector.broadcast %cst_30 : f32 to vector<8x1xf32>
    %50 = arith.addf %48, %49 : vector<8x1xf32>
    %51 = math.rsqrt %50 : vector<8x1xf32>
    %52 = vector.broadcast %51 : vector<8x1xf32> to vector<8x32xf32>
    %53 = arith.mulf %43, %52 : vector<8x32xf32>
    %54 = vector.broadcast %36 : vector<1x32xf32> to vector<8x32xf32>
    %55 = arith.mulf %53, %54 : vector<8x32xf32>
    %56 = vector.broadcast %37 : vector<1x32xf32> to vector<8x32xf32>
    %57 = arith.addf %55, %56 : vector<8x32xf32>
    %58 = arith.truncf %57 : vector<8x32xf32> to vector<8x32xbf16>
    %c0_31 = arith.constant 0 : index
    %c0_32 = arith.constant 0 : index
    %59 = vector.load %arg11[%c0_31, %c0_32] : memref<32x128xbf16, #tpu.memory_space<vmem>>, vector<32x128xbf16>
    %cst_33 = arith.constant dense<0.000000e+00> : vector<8x128xf32>
    %60 = tpu.matmul %58, %59, %cst_33 {dimension_numbers = #tpu.dot_dimension_numbers<[1], [0], [0], [1], [0, 0, 1, 1], [], []>} : vector<8x32xbf16>, vector<32x128xbf16>, vector<8x128xf32> -> vector<8x128xf32>
    %c0_34 = arith.constant 0 : index
    %c0_35 = arith.constant 0 : index
    %61 = vector.load %arg12[%c0_34, %c0_35] : memref<1x128xf32, #tpu.memory_space<vmem>>, vector<1x128xf32>
    %62 = vector.broadcast %61 : vector<1x128xf32> to vector<8x128xf32>
    %63 = arith.addf %60, %62 : vector<8x128xf32>
    %cst_36 = arith.constant 5.000000e-01 : f32
    %64 = vector.broadcast %cst_36 : f32 to vector<8x128xf32>
    %65 = arith.mulf %64, %63 : vector<8x128xf32>
    %cst_37 = arith.constant 0.707106769 : f32
    %66 = vector.broadcast %cst_37 : f32 to vector<8x128xf32>
    %67 = arith.mulf %63, %66 : vector<8x128xf32>
    %cst_38 = arith.constant 0.000000e+00 : f32
    %68 = vector.broadcast %cst_38 : f32 to vector<8x128xf32>
    %69 = arith.cmpf oge, %67, %68 : vector<8x128xf32>
    %cst_39 = arith.constant 1.000000e+00 : f32
    %cst_40 = arith.constant -1.000000e+00 : f32
    %70 = vector.broadcast %cst_39 : f32 to vector<8x128xf32>
    %71 = vector.broadcast %cst_40 : f32 to vector<8x128xf32>
    %72 = arith.select %69, %70, %71 : vector<8x128xi1>, vector<8x128xf32>
    %73 = math.absf %67 : vector<8x128xf32>
    %cst_41 = arith.constant 0.327591091 : f32
    %74 = vector.broadcast %cst_41 : f32 to vector<8x128xf32>
    %75 = arith.mulf %74, %73 : vector<8x128xf32>
    %cst_42 = arith.constant 1.000000e+00 : f32
    %76 = vector.broadcast %cst_42 : f32 to vector<8x128xf32>
    %77 = arith.addf %76, %75 : vector<8x128xf32>
    %78 = tpu.reciprocal %77 {approx = true} : vector<8x128xf32> -> vector<8x128xf32>
    %cst_43 = arith.constant 1.06140542 : f32
    %79 = vector.broadcast %cst_43 : f32 to vector<8x128xf32>
    %80 = arith.mulf %79, %78 : vector<8x128xf32>
    %cst_44 = arith.constant -1.45315206 : f32
    %81 = vector.broadcast %cst_44 : f32 to vector<8x128xf32>
    %82 = arith.addf %80, %81 : vector<8x128xf32>
    %83 = arith.mulf %82, %78 : vector<8x128xf32>
    %cst_45 = arith.constant 1.42141378 : f32
    %84 = vector.broadcast %cst_45 : f32 to vector<8x128xf32>
    %85 = arith.addf %83, %84 : vector<8x128xf32>
    %86 = arith.mulf %85, %78 : vector<8x128xf32>
    %cst_46 = arith.constant -0.284496725 : f32
    %87 = vector.broadcast %cst_46 : f32 to vector<8x128xf32>
    %88 = arith.addf %86, %87 : vector<8x128xf32>
    %89 = arith.mulf %88, %78 : vector<8x128xf32>
    %cst_47 = arith.constant 0.254829586 : f32
    %90 = vector.broadcast %cst_47 : f32 to vector<8x128xf32>
    %91 = arith.addf %89, %90 : vector<8x128xf32>
    %92 = arith.mulf %91, %78 : vector<8x128xf32>
    %cst_48 = arith.constant 0.000000e+00 : f32
    %93 = vector.broadcast %cst_48 : f32 to vector<8x128xf32>
    %94 = arith.subf %93, %73 : vector<8x128xf32>
    %95 = arith.mulf %94, %73 : vector<8x128xf32>
    %96 = math.exp %95 : vector<8x128xf32>
    %97 = arith.mulf %92, %96 : vector<8x128xf32>
    %cst_49 = arith.constant 1.000000e+00 : f32
    %98 = vector.broadcast %cst_49 : f32 to vector<8x128xf32>
    %99 = arith.subf %98, %97 : vector<8x128xf32>
    %100 = arith.mulf %72, %99 : vector<8x128xf32>
    %cst_50 = arith.constant 1.000000e+00 : f32
    %101 = vector.broadcast %cst_50 : f32 to vector<8x128xf32>
    %102 = arith.addf %101, %100 : vector<8x128xf32>
    %103 = arith.mulf %65, %102 : vector<8x128xf32>
    %104 = arith.truncf %103 : vector<8x128xf32> to vector<8x128xbf16>
    %c0_51 = arith.constant 0 : index
    %c0_52 = arith.constant 0 : index
    %105 = vector.load %arg13[%c0_51, %c0_52] : memref<128x32xbf16, #tpu.memory_space<vmem>>, vector<128x32xbf16>
    %cst_53 = arith.constant dense<0.000000e+00> : vector<8x32xf32>
    %106 = tpu.matmul %104, %105, %cst_53 {dimension_numbers = #tpu.dot_dimension_numbers<[1], [0], [0], [1], [0, 0, 1, 1], [], []>} : vector<8x128xbf16>, vector<128x32xbf16>, vector<8x32xf32> -> vector<8x32xf32>
    %c0_54 = arith.constant 0 : index
    %c0_55 = arith.constant 0 : index
    %107 = vector.load %arg14[%c0_54, %c0_55] : memref<1x32xf32, #tpu.memory_space<vmem>>, vector<1x32xf32>
    %108 = vector.broadcast %107 : vector<1x32xf32> to vector<8x32xf32>
    %109 = arith.addf %106, %108 : vector<8x32xf32>
    %110 = arith.addf %35, %109 : vector<8x32xf32>
    %c0_56 = arith.constant 0 : index
    %c0_57 = arith.constant 0 : index
    %c0_58 = arith.constant 0 : index
    %111 = vector.load %arg15[%c0_56, %c0_57, %c0_58] : memref<1x8x32xf32, #tpu.memory_space<vmem>>, vector<1x8x32xf32>
    %112 = vector.shape_cast %111 : vector<1x8x32xf32> to vector<8x32xf32>
    %113 = vector.shape_cast %110 : vector<8x32xf32> to vector<1x8x32xf32>
    tpu.vector_store %arg15[%c0_56, %c0_57, %c0_58], %113 {strides = array<i32>} : memref<1x8x32xf32, #tpu.memory_space<vmem>>, vector<1x8x32xf32>,
    return
  }
  func.func @transform_0(%arg0: i32, %arg1: i32) -> (i32, i32, i32) {
    %c0_i32 = arith.constant 0 : i32
    %c0_i32_0 = arith.constant 0 : i32
    %c0_i32_1 = arith.constant 0 : i32
    return %arg0, %c0_i32, %c0_i32_0 : i32, i32, i32
  }
  func.func @transform_1(%arg0: i32, %arg1: i32) -> (i32, i32) {
    %c0_i32 = arith.constant 0 : i32
    %c0_i32_0 = arith.constant 0 : i32
    %c0_i32_1 = arith.constant 0 : i32
    return %c0_i32, %c0_i32_0 : i32, i32
  }
  func.func @transform_2(%arg0: i32, %arg1: i32) -> (i32, i32) {
    %c0_i32 = arith.constant 0 : i32
    %c0_i32_0 = arith.constant 0 : i32
    %c0_i32_1 = arith.constant 0 : i32
    return %c0_i32, %c0_i32_0 : i32, i32
  }
  func.func @transform_3(%arg0: i32, %arg1: i32) -> (i32, i32) {
    %c0_i32 = arith.constant 0 : i32
    %c0_i32_0 = arith.constant 0 : i32
    %c0_i32_1 = arith.constant 0 : i32
    return %c0_i32, %c0_i32_0 : i32, i32
  }
  func.func @transform_4(%arg0: i32, %arg1: i32) -> (i32, i32) {
    %c0_i32 = arith.constant 0 : i32
    %c0_i32_0 = arith.constant 0 : i32
    %c0_i32_1 = arith.constant 0 : i32
    return %c0_i32, %c0_i32_0 : i32, i32
  }
  func.func @transform_5(%arg0: i32, %arg1: i32) -> (i32, i32) {
    %c0_i32 = arith.constant 0 : i32
    %c0_i32_0 = arith.constant 0 : i32
    %c0_i32_1 = arith.constant 0 : i32
    return %c0_i32, %c0_i32_0 : i32, i32
  }
  func.func @transform_6(%arg0: i32, %arg1: i32) -> (i32, i32) {
    %c0_i32 = arith.constant 0 : i32
    %c0_i32_0 = arith.constant 0 : i32
    %c0_i32_1 = arith.constant 0 : i32
    return %c0_i32, %c0_i32_0 : i32, i32
  }
  func.func @transform_7(%arg0: i32, %arg1: i32) -> (i32, i32) {
    %c0_i32 = arith.constant 0 : i32
    %c0_i32_0 = arith.constant 0 : i32
    %c0_i32_1 = arith.constant 0 : i32
    return %c0_i32, %c0_i32_0 : i32, i32
  }
  func.func @transform_8(%arg0: i32, %arg1: i32) -> (i32, i32) {
    %c0_i32 = arith.constant 0 : i32
    %c0_i32_0 = arith.constant 0 : i32
    %c0_i32_1 = arith.constant 0 : i32
    return %c0_i32, %c0_i32_0 : i32, i32
  }
  func.func @transform_9(%arg0: i32, %arg1: i32) -> (i32, i32) {
    %c0_i32 = arith.constant 0 : i32
    %c0_i32_0 = arith.constant 0 : i32
    %c0_i32_1 = arith.constant 0 : i32
    return %c0_i32, %c0_i32_0 : i32, i32
  }
  func.func @transform_10(%arg0: i32, %arg1: i32) -> (i32, i32) {
    %c0_i32 = arith.constant 0 : i32
    %c0_i32_0 = arith.constant 0 : i32
    %c0_i32_1 = arith.constant 0 : i32
    return %c0_i32, %c0_i32_0 : i32, i32
  }
  func.func @transform_11(%arg0: i32, %arg1: i32) -> (i32, i32) {
    %c0_i32 = arith.constant 0 : i32
    %c0_i32_0 = arith.constant 0 : i32
    %c0_i32_1 = arith.constant 0 : i32
    return %c0_i32, %c0_i32_0 : i32, i32
  }
  func.func @transform_12(%arg0: i32, %arg1: i32) -> (i32, i32) {
    %c0_i32 = arith.constant 0 : i32
    %c0_i32_0 = arith.constant 0 : i32
    %c0_i32_1 = arith.constant 0 : i32
    return %c0_i32, %c0_i32_0 : i32, i32
  }
  func.func @transform_13(%arg0: i32, %arg1: i32) -> (i32, i32, i32) {
    %c0_i32 = arith.constant 0 : i32
    %c0_i32_0 = arith.constant 0 : i32
    return %arg0, %arg1, %c0_i32 : i32, i32, i32
  }
}

</mosaic_0001>

<bundles_post_ra>
// kernel: tpu_custom_call.1
= control target key start
LH: loop header
LB: loop body
LE: loop exit
PB: predicated region body
PF: predicated region fallthrough
CT: control target
= control target key end

     0   :  { %s3239_s0 = inlined_call_operand.vmem [shape: f32[2,16,32], index: 0, kind: input, shape index: {}]   ;;  %s3240_s1 = inlined_call_operand.hbm [shape: f32[1,32], index: 1, kind: input, shape index: {}]   ;;  %s3241_s2 = inlined_call_operand.vmem [shape: f32[1,32], index: 2, kind: input, shape index: {}]   ;;  %s3242_s3 = inlined_call_operand.vmem [shape: bf16[32,96], index: 3, kind: input, shape index: {}]   ;;  %s3243_s4 = inlined_call_operand.vmem [shape: f32[1,96], index: 4, kind: input, shape index: {}]   ;;  %s3244_s5 = inlined_call_operand.vmem [shape: bf16[32,32], index: 5, kind: input, shape index: {}]   ;;  %s3245_s6 = inlined_call_operand.vmem [shape: f32[1,32], index: 6, kind: input, shape index: {}]   ;;  %s3246_s7 = inlined_call_operand.vmem [shape: f32[1,32], index: 7, kind: input, shape index: {}]   ;;  %s3247_s8 = inlined_call_operand.vmem [shape: f32[1,32], index: 8, kind: input, shape index: {}]   ;;  %s3248_s9 = inlined_call_operand.vmem [shape: bf16[32,128], index: 9, kind: input, shape index: {}]   ;;  %s3249_s10 = inlined_call_operand.vmem [shape: f32[1,128], index: 10, kind: input, shape index: {}]   ;;  %s3250_s11 = inlined_call_operand.vmem [shape: bf16[128,32], index: 11, kind: input, shape index: {}]   ;;  %s3251_s12 = inlined_call_operand.vmem [shape: f32[1,32], index: 12, kind: input, shape index: {}]   ;;  %s3252_s13 = inlined_call_operand.hbm [shape: f32[2,16,32], index: 13, kind: output, shape index: {}]  }
   0x1   :  { %3260 = sst [smem:[#allocation15_spill]] %s3239_s0 }
   0x2   :  { %3261 = sst [smem:[#allocation16_spill]] %s3240_s1 }
   0x3   :  { %3262 = sst [smem:[#allocation17_spill]] %s3241_s2 }
   0x4   :  { %3263 = sst [smem:[#allocation18_spill]] %s3242_s3 }
   0x5   :  { %3264 = sst [smem:[#allocation19_spill]] %s3243_s4 }
   0x6   :  { %3265 = sst [smem:[#allocation20_spill]] %s3251_s12 }
   0x7   :  { %3266 = sst [smem:[#allocation21_spill]] %s3252_s13 }
   0x8   :  { %18 = vsyncpa [#allocation6], 0 }
   0x9   :  { %19 = vsyncpa [#allocation7], 0 }
   0xa   :  { %21 = vsyncpa [#allocation7 + $0x1], 0  ;;  %s2649_s25 = smov 0   ;;  %s2651_s26 = smov 0  }
   0xb   :  { %s2653_s27 = smov 0   ;;  %s2655_s28 = smov 0  }
   0xc   :  { %s2657_s29 = smov 0   ;;  %s2659_s30 = smov 0  }
   0xd   :  { %s2661_s14 = smov 0   ;;  %s2663_s15 = smov 0  }
   0xe LB: > { %3267 = sst [smem:[#allocation11_spill]] %s2533_s25  ;;  %s2090_s16 = sadd.s32 4294967295, %s2561_s15   ;;  %s2561_s15 = sphi %s2663_s15, %s27_s15   ;;  %s2557_s14 = sphi %s2661_s14, %s3291_s14   ;;  %s2553_s30 = sphi %s2659_s30, %s3286_s30   ;;  %s2549_s29 = sphi %s2657_s29, %s3290_s29   ;;  %s2545_s28 = sphi %s2655_s28, %s3285_s28   ;;  %s2541_s27 = sphi %s2653_s27, %s3289_s27   ;;  %s2537_s26 = sphi %s2651_s26, %s3288_s26   ;;  %s2533_s25 = sphi %s2649_s25, %s3287_s25  }
   0xf   : > { %3268 = sst [smem:[#allocation12_spill]] %s2553_s30  ;;  %s2091_s17 = sadd.s32 4294967294, %s2561_s15  }
  0x10   : > { %s36_s18 = sadd.s32 1, %s2553_s30  ;;  %s39_s19 = sadd.s32 1, %s2557_s14 }
  0x11   : > { %p37_p0 = scmp.ge.s32.totalorder %s36_s18, 2  ;;  %s326_s20 = sadd.s32 1, %s2541_s27 }
  0x12   : > { %p336_p1 = scmp.ne.s32.totalorder %s2541_s27, %s2537_s26  ;;  %p337_p2 = scmp.eq.s32.totalorder %s2090_s16, 3 }
  0x13   : > { %s3293_s18 = smov (%p37_p0, %s36_s18), 0  ;;  %s3295_s19 = smov (!%p37_p0, %s39_s19), %s2557_s14 }
  0x14   : > { %3269 = sst [smem:[#allocation13_spill]] %s3293_s18  ;;  %s322_s21 = ssub.s32 %s2553_s30, %s3293_s18 }
  0x15   : > { %p2701_p3 = por %p337_p2, %p336_p1  ;;  %p41_p4 = scmp.ge.s32.totalorder %s3295_s19, 2 }
  0x16   : > { %p342_p5 = scmp.ne.s32.totalorder %s2537_s26, %s2533_s25  ;;  %p343_p6 = scmp.eq.s32.totalorder %s2091_s17, 3 }
  0x17   : > { %s3270_s22 = scalar_select %p2701_p3, 1, 0 }
  0x18   : > { %p2092_p7 = scmp.ge.s32.totalorder %s2561_s15, 1  ;;  %s3297_s19 = smov (%p41_p4, %s3295_s19), 0 }
  0x19   : > { %3271 = sst [smem:[#allocation14_spill]] %s3270_s22  ;;  %p2710_p8 = por %p343_p6, %p342_p5 }
  0x1a   : > { %p350_p9 = scmp.lt.s32.totalorder %s2561_s15, 5  ;;  %s321_s24 = ssub.s32 %s2557_s14, %s3297_s19 }
  0x1b   : > { %s323_s13 = sor.u32 %s322_s21, %s321_s24  ;;  %p2244_p12 = scmp.eq.s32.totalorder %s2090_s16, 0 }
  0x1c   : > { %p351_p10 = pnand %p2092_p7, %p350_p9  ;;  %p324_p11 = scmp.eq.s32.totalorder %s323_s13, 0 }
  0x1d   : > { %s3273_s1 = sld [smem:[#allocation16_spill]]  ;;  %s2563_s22 = smov [#allocation5]  }
  0x1e   : > { %p2236_p13 = pneg %p351_p10  ;;  %s364_s12 = sshll.u32 %s2563_s22, 4  ;;  %s365_s12 = int_to_ptr.vmem [resolvable:$true] %s364_s12 }
  0x1f   : > { %s2721_s17 = scalar_select %p324_p11, %s2541_s27, %s326_s20  }
  0x20   : > { %p2237_p0 = pnand %p2244_p12, %p2236_p13  ;;  %418 = sbr.rel (%p351_p10) target bundleno = 2144 (0x860), region = 72 }
  0x23   : > { %s362_s25 = sshll.u32 %s3273_s1, 4  ;;  %s363_s25 = int_to_ptr.hbm [resolvable:$true] %s362_s25 }
  0x24   : > { %2239 = dma.hbm_to_vmem [thread:$0]  (!%p2237_p0), %s363_s25, 16, %s365_s12, [#allocation6]  }
  0x25   : > { %2524 = dma.done.wait (%p2244_p12), [#allocation6], 16  }
  0x26   : > { %2526 = vsyncadd (%p2244_p12), [#allocation6], 4294967280  ;;  %s3259_s13 = sand.u32 1, %s2537_s26   ;;  %p463_p1 = scmp.lt.s32.totalorder %s2549_s29, 1  ;;  %v2735_v0 = vld [vmem:[#allocation5] sm:$0x1] }
  0x27   : > { %s2727_s30 = sshll.u32 %s3259_s13, 3  ;;  %s3274_s0 = sld [smem:[#allocation15_spill]] }
  0x28   : > { %s464_s16 = scalar_select %p463_p1, %s2549_s29, 1 }
  0x29   : > { %s3275_s2 = sld [smem:[#allocation17_spill]]  ;;  %p2100_p2 = scmp.ne.s32.totalorder %s2545_s28, 0 }
  0x2a   : > { %s2207_s18 = sshll.u32 %s464_s16, 4  ;;  %s3276_s3 = sld [smem:[#allocation18_spill]] (!%p2100_p2) }
  0x2b   : > { %474 = sbr.rel (%p2100_p2) target bundleno = 746 (0x2ea), region = 80  ;;  %s3277_s4 = sld [smem:[#allocation19_spill]] (!%p2100_p2) }
  0x2c   : > { %s2565_s16 = smov (!%p2100_p2), 104   ;;  %s2567_s20 = smov (!%p2100_p2), 120  }
  0x2d   : > { %s2733_s22 = scalar_lea.vmem %s3274_s0, %s2207_s18  ;;  %s2566_s18 = smov (!%p2100_p2), 112  }
  0x2e   : > { %s2568_s21 = smov (!%p2100_p2), 96   ;;  %s2569_s13 = smov (!%p2100_p2), 64  }
  0x2f   : > { %v2740_v1 = vld [vmem:[%s3275_s2] sm:$0x1] }
  0x30   : > { %v475_v2 = vld [vmem:[%s2733_s22] sm:$0xff]  ;;  %vm477_vm0 = vcmask 261120   ;;  %v476_v4 = vld [vmem:[%s2733_s22 + $0x8] sm:$0xff]  ;;  %v2564_v6 = vmov 32.0   ;;  %v530_v44 = vperm.slane %v2735_v0, 0  ;;  %v535_v49 = vperm.slane %v2740_v1, 0 }
  0x31   : > { %v478_v3 = vsel %vm477_vm0, %v475_v2, 0.0  ;;  %v481_v5 = vsel %vm477_vm0, %v476_v4, 0.0  ;;  %2398 = vrcp.f32 %v2564_v6  ;;  %v2209_v23 = vld [vmem:[%s3276_s3 + $0x8] sm:$0xff]  ;;  %v2208_v25 = vld [vmem:[%s3276_s3] sm:$0xff]  ;;  %vm600_vm8 = vcmask 1047556  }
  0x32   : > { %479 = vadd.xlane.f32.xlu0 %v478_v3  ;;  %569 = vmatpush.bf16.msra.mxu0 %v2209_v23  ;;  %v2397_v55 = vld [vmem:[%s3277_s4] ss:$0 sm:$0xff]  ;;  %vm1114_vm9 = vcmask 60416  }
  0x36   : > { %570 = vmatpush.bf16.msra.mxu0 %v2208_v25 }
  0x37   : > { %v2399_v7 = vpop.eup %2398 }
  0x38   : > { %v485_v8 = vmul.f32 32.0, %v2399_v7  ;;  %vm489_vm1 = vweird.f32 %v2399_v7 }
  0x3a   : > { %482 = vadd.xlane.f32.xlu0 %v481_v5  ;;  %v486_v9 = vsub.f32 1.0, %v485_v8 }
  0x3c   : > { %v487_v10 = vmul.f32 %v2399_v7, %v486_v9 }
  0x3e   : > { %v488_v11 = vadd.f32 %v2399_v7, %v487_v10 }
  0x40   : > { %v490_v12 = vsel %vm489_vm1, %v2399_v7, %v488_v11 }
  0xa5   : > { %v480_v13 = vpop.xlane.xlu0 %479 }
  0xa6   : > { %v491_v14 = vmul.f32 %v490_v12, %v480_v13 }
  0xa8   : > { %v493_v15 = vsub.f32 %v475_v2, %v491_v14 }
  0xaa   : > { %v495_v16 = vmul.f32 %v493_v15, %v493_v15 }
  0xac   : > { %v497_v17 = vsel %vm477_vm0, %v495_v16, 0.0 }
  0xad   : > { %498 = vadd.xlane.f32.xlu1 %v497_v17  ;;  %v483_v18 = vpop.xlane.xlu0 %482 }
  0xae   : > { %v492_v19 = vmul.f32 %v490_v12, %v483_v18 }
  0xb0   : > { %v494_v20 = vsub.f32 %v476_v4, %v492_v19  ;;  %v2570_v4 = vmov 1983009808   ;;  %v2571_v19 = vmov 1934713408  }
  0xb1   : > { %v605_v5 = vunpack.c.l.s4 %v2570_v4 }
  0xb2   : > { %v496_v21 = vmul.f32 %v494_v20, %v494_v20 }
  0xb3   : > { %v2766_v11 = vunpack.c.0.s8 %v605_v5 }
  0xb4   : > { %v500_v22 = vsel %vm477_vm0, %v496_v21, 0.0 }
  0xb5   : > { %501 = vadd.xlane.f32.xlu1 %v500_v22 }
 0x120   : > { %v499_v24 = vpop.xlane.xlu1 %498 }
 0x121   : > { %v503_v26 = vmul.f32 %v499_v24, %v490_v12 }
 0x123   : > { %v505_v27 = vadd.f32 1e-05, %v503_v26 }
 0x125   : > { %2400 = vrsqrt.f32 %v505_v27  ;;  %vm513_vm3 = vweird.f32 %v505_v27 }
 0x128   : > { %v502_v28 = vpop.xlane.xlu1 %501 }
 0x129   : > { %v504_v29 = vmul.f32 %v502_v28, %v490_v12 }
 0x12b   : > { %v2401_v30 = vpop.eup %2400  ;;  %v506_v31 = vadd.f32 1e-05, %v504_v29 }
 0x12c   : > { %v508_v32 = vmul.f32 %v2401_v30, %v505_v27  ;;  %vm514_vm2 = vweird.f32 %v2401_v30 }
 0x12d   : > { %2402 = vrsqrt.f32 %v506_v31  ;;  %vm515_vm4 = vmor %vm513_vm3, %vm514_vm2  ;;  %vm523_vm6 = vweird.f32 %v506_v31 }
 0x12e   : > { %v509_v33 = vmul.f32 %v2401_v30, %v508_v32 }
 0x130   : > { %v510_v34 = vmul.f32 0.5, %v509_v33 }
 0x132   : > { %v511_v35 = vsub.f32 1.5, %v510_v34 }
 0x133   : > { %v2403_v36 = vpop.eup %2402 }
 0x134   : > { %v512_v37 = vmul.f32 %v2401_v30, %v511_v35  ;;  %v518_v38 = vmul.f32 %v2403_v36, %v506_v31  ;;  %vm524_vm5 = vweird.f32 %v2403_v36 }
 0x135   : > { %vm525_vm7 = vmor %vm523_vm6, %vm524_vm5 }
 0x136   : > { %v519_v39 = vmul.f32 %v2403_v36, %v518_v38  ;;  %v516_v40 = vsel %vm515_vm4, %v2401_v30, %v512_v37 }
 0x137   : > { %v527_v43 = vmul.f32 %v516_v40, %v493_v15 }
 0x138   : > { %v520_v41 = vmul.f32 0.5, %v519_v39 }
 0x139   : > { %v532_v48 = vmul.f32 %v530_v44, %v527_v43 }
 0x13a   : > { %v521_v42 = vsub.f32 1.5, %v520_v41 }
 0x13b   : > { %v537_v51 = vadd.f32 %v535_v49, %v532_v48 }
 0x13c   : > { %v522_v45 = vmul.f32 %v2403_v36, %v521_v42 }
 0x13e   : > { %v526_v46 = vsel %vm525_vm7, %v2403_v36, %v522_v45 }
 0x13f   : > { %v528_v47 = vmul.f32 %v526_v46, %v494_v20  ;;  %v629_v20 = vunpack.c.l.s4 %v2571_v19 }
 0x141   : > { %v533_v50 = vmul.f32 %v530_v44, %v528_v47  ;;  %v2776_v32 = vunpack.c.0.s8 %v629_v20 }
 0x143   : > { %v538_v52 = vadd.f32 %v535_v49, %v533_v50 }
 0x145   : > { %v539_v53 = vpack.c.bf16 %v538_v52, %v537_v51 }
 0x147   : > { %2109 = vmatmul.msk.bf16.vlgmr.msra.gmra.mxu0 %vm477_vm0, %v539_v53 }
 0x1c4   : > { %v572_v54 = vpop.f32.mrf.mxu0 }
 0x1c5   : > { %v573_v56 = vadd.f32 %v2397_v55, %v572_v54 }
 0x1c7   : > { %v577_v60 = vmul.f32 0.35355338, %v573_v56 }
 0x1c9   : > { %v602_v10 = vrot.slane %v577_v60, 4 }
 0x1cc   : > { %v574_v57 = vpop.f32.mrf.mxu0 }
 0x1cd   : > { %v575_v58 = vadd.f32 %v2397_v55, %v574_v57 }
 0x1cf   : > { %v2337_v59 = vpack.i.bf16 %v575_v58, %v573_v56  ;;  %v578_v61 = vmul.f32 0.35355338, %v575_v58 }
 0x1d1   : > { %2338 = vrot.lane.b32.xlu0 %v2337_v59, %s2565_s16  ;;  %2328 = vrot.lane.b32.xlu2 %v2337_v59, %s2566_s18  ;;  %v2352_v62 = vpack.i.bf16 %v578_v61, %v577_v60  ;;  %v658_v9 = vrot.slane %v578_v61, 4 }
 0x1d3   : > { %2353 = vrot.lane.b32.xlu1 %v2352_v62, %s2566_s18 }
 0x1d9   : > { %2333 = vrot.lane.b32.xlu2 %v2337_v59, %s2567_s20 }
 0x1db   : > { %2363 = vrot.lane.b32.xlu1 %v2352_v62, %s2565_s16 }
 0x1e1   : > { %2343 = vrot.lane.b32.xlu2 %v2337_v59, %s2568_s21 }
 0x1e9   : > { %2348 = vrot.lane.b32.xlu2 %v2337_v59, %s2569_s13 }
 0x1f1   : > { %2358 = vrot.lane.b32.xlu2 %v2352_v62, %s2567_s20 }
 0x22b   : > { %v2329_v63 = vpop.permute.xlu2 %2328 }
 0x22c   : > { %2373 = vrot.lane.b32.xlu0 %v2329_v63, %s2569_s13  ;;  %2368 = vrot.lane.b32.xlu2 %v2329_v63, %s2568_s21 }
 0x233   : > { %v2334_v0 = vpop.permute.xlu2 %2333 }
 0x234   : > { %2378 = vrot.lane.b32.xlu0 %v2334_v0, %s2568_s21  ;;  %2388 = vrot.lane.b32.xlu1 %v2334_v0, %s2569_s13 }
 0x23b   : > { %v2762_v1 = vpop.permute.xlu2 %2343 }
 0x243   : > { %v2339_v2 = vpop.permute.xlu0 %2338  ;;  %v2764_v3 = vpop.permute.xlu2 %2348 }
 0x244   : > { %2393 = vrot.lane.b32.xlu0 %v2339_v2, %s2569_s13  ;;  %2383 = vrot.lane.b32.xlu2 %v2339_v2, %s2568_s21 }
 0x245   : > { %v2354_v6 = vpop.permute.xlu1 %2353 }
 0x246   : > { %v2356_v7 = vunpack.i.h.bf16 %v2354_v6  ;;  %v2355_v8 = vunpack.i.l.bf16 %v2354_v6 }
 0x248   : > { %v656_v12 = vrot.slane %v2356_v7, 4  ;;  %v599_v13 = vrot.slane %v2355_v8, 4  ;;  %v659_v14 = vsel %vm600_vm8, %v2356_v7, %v658_v9  ;;  %v603_v15 = vsel %vm600_vm8, %v2355_v8, %v602_v10 }
 0x249   : > { %v667_v21 = vperm.slane %v659_v14, %v2766_v11  ;;  %v611_v22 = vperm.slane %v603_v15, %v2766_v11 }
 0x24a   : > { %v657_v17 = vsel %vm600_vm8, %v656_v12, %v578_v61  ;;  %v601_v18 = vsel %vm600_vm8, %v599_v13, %v577_v60 }
 0x24b   : > { %v2359_v16 = vpop.permute.xlu2 %2358  ;;  %v663_v28 = vperm.slane %v657_v17, %v2766_v11  ;;  %v607_v29 = vperm.slane %v601_v18, %v2766_v11  ;;  %v694_v35 = vrot.slane %v667_v21, 4  ;;  %v638_v36 = vrot.slane %v611_v22, 4 }
 0x24c   : > { %v2361_v23 = vunpack.i.h.bf16 %v2359_v16  ;;  %v2360_v24 = vunpack.i.l.bf16 %v2359_v16 }
 0x24d   : > { %v2364_v25 = vpop.permute.xlu1 %2363  ;;  %v682_v43 = vrot.slane %v663_v28, 4  ;;  %v626_v44 = vrot.slane %v607_v29, 4 }
 0x24e   : > { %v2366_v26 = vunpack.i.h.bf16 %v2364_v25  ;;  %v2365_v27 = vunpack.i.l.bf16 %v2364_v25  ;;  %v670_v30 = vrot.slane %v2361_v23, 4  ;;  %v614_v31 = vrot.slane %v2360_v24, 4 }
 0x250   : > { %v668_v33 = vrot.slane %v2366_v26, 4  ;;  %v612_v34 = vrot.slane %v2365_v27, 4  ;;  %v671_v37 = vsel %vm600_vm8, %v2366_v26, %v670_v30  ;;  %v615_v38 = vsel %vm600_vm8, %v2365_v27, %v614_v31 }
 0x251   : > { %v679_v40 = vperm.slane %v671_v37, %v2766_v11  ;;  %v623_v42 = vperm.slane %v615_v38, %v2766_v11 }
 0x252   : > { %v669_v39 = vsel %vm600_vm8, %v668_v33, %v2361_v23  ;;  %v613_v41 = vsel %vm600_vm8, %v612_v34, %v2360_v24 }
 0x253   : > { %v675_v45 = vperm.slane %v669_v39, %v2766_v11  ;;  %v619_v46 = vperm.slane %v613_v41, %v2766_v11  ;;  %v692_v47 = vrot.slane %v679_v40, 4  ;;  %v636_v48 = vrot.slane %v623_v42, 4 }
 0x254   : > { %v639_v49 = vsel %vm600_vm8, %v623_v42, %v638_v36  ;;  %v695_v50 = vsel %vm600_vm8, %v679_v40, %v694_v35 }
 0x255   : > { %v680_v51 = vrot.slane %v675_v45, 4  ;;  %v624_v52 = vrot.slane %v619_v46, 4  ;;  %v627_v53 = vsel %vm600_vm8, %v619_v46, %v626_v44  ;;  %v647_v54 = vperm.slane %v639_v49, %v2776_v32 }
 0x256   : > { %v635_v55 = vperm.slane %v627_v53, %v2776_v32  ;;  %v637_v56 = vsel %vm600_vm8, %v636_v48, %v611_v22  ;;  %v683_v57 = vsel %vm600_vm8, %v675_v45, %v682_v43  ;;  %v693_v58 = vsel %vm600_vm8, %v692_v47, %v667_v21 }
 0x257   : > { %v625_v59 = vsel %vm600_vm8, %v624_v52, %v607_v29  ;;  %v643_v60 = vperm.slane %v637_v56, %v2776_v32  ;;  %v654_v61 = vrot.slane %v647_v54, 4  ;;  %v681_v62 = vsel %vm600_vm8, %v680_v51, %v663_v28 }
 0x258   : > { %v631_v63 = vperm.slane %v625_v59, %v2776_v32  ;;  %v650_v0 = vrot.slane %v635_v55, 4  ;;  %v687_v2 = vperm.slane %v681_v62, %v2776_v32  ;;  %v691_v4 = vperm.slane %v683_v57, %v2776_v32 }
 0x259   : > { %v652_v5 = vrot.slane %v643_v60, 4  ;;  %v655_v6 = vsel %vm600_vm8, 0.0, %v654_v61  ;;  %v699_v7 = vperm.slane %v693_v58, %v2776_v32  ;;  %v703_v8 = vperm.slane %v695_v50, %v2776_v32 }
 0x25a   : > { %v648_v9 = vrot.slane %v631_v63, 4  ;;  %v651_v10 = vsel %vm600_vm8, 0.0, %v650_v0  ;;  %v704_v12 = vrot.slane %v687_v2, 4  ;;  %v706_v13 = vrot.slane %v691_v4, 4 }
 0x25b   : > { %v653_v14 = vsel %vm600_vm8, 0.0, %v652_v5  ;;  %v708_v15 = vrot.slane %v699_v7, 4  ;;  %v710_v16 = vrot.slane %v703_v8, 4  ;;  %v998_v17 = vsel %vm600_vm8, %v650_v0, %v631_v63 }
 0x25c   : > { %v649_v18 = vsel %vm600_vm8, 0.0, %v648_v9  ;;  %v705_v19 = vsel %vm600_vm8, 0.0, %v704_v12  ;;  %v707_v20 = vsel %vm600_vm8, 0.0, %v706_v13  ;;  %v1002_v21 = vperm.slane %v998_v17, %v2766_v11 }
 0x25d   : > { %v709_v22 = vsel %vm600_vm8, 0.0, %v708_v15  ;;  %v711_v23 = vsel %vm600_vm8, 0.0, %v710_v16  ;;  %v1003_v24 = vrot.slane %v651_v10, 4  ;;  %v1009_v25 = vsel %vm600_vm8, %v654_v61, %v643_v60 }
 0x25e   : > { %v1013_v26 = vperm.slane %v1009_v25, %v2766_v11  ;;  %v1014_v27 = vrot.slane %v655_v6, 4  ;;  %v1022_v28 = vrot.slane %v1002_v21, 4  ;;  %v1052_v29 = vsel %vm600_vm8, %v706_v13, %v687_v2 }
 0x25f   : > { %v1004_v30 = vsel %vm600_vm8, %v1003_v24, %v649_v18  ;;  %v1056_v31 = vperm.slane %v1052_v29, %v2766_v11  ;;  %v1057_v33 = vrot.slane %v707_v20, 4  ;;  %v1063_v34 = vsel %vm600_vm8, %v710_v16, %v699_v7 }
 0x260   : > { %v1008_v35 = vperm.slane %v1004_v30, %v2766_v11  ;;  %v1015_v36 = vsel %vm600_vm8, %v1014_v27, %v653_v14  ;;  %v1034_v37 = vrot.slane %v1013_v26, 4  ;;  %v1067_v38 = vperm.slane %v1063_v34, %v2766_v11 }
 0x261   : > { %v1019_v39 = vperm.slane %v1015_v36, %v2766_v11  ;;  %v1058_v40 = vsel %vm600_vm8, %v1057_v33, %v705_v19  ;;  %v1068_v41 = vrot.slane %v711_v23, 4  ;;  %v1076_v42 = vrot.slane %v1056_v31, 4 }
 0x262   : > { %v1020_v43 = vrot.slane %v1008_v35, 4  ;;  %v1023_v44 = vsel %vm600_vm8, %v1008_v35, %v1022_v28  ;;  %v1062_v45 = vperm.slane %v1058_v40, %v2766_v11  ;;  %v1088_v46 = vrot.slane %v1067_v38, 4 }
 0x263   : > { %v1031_v47 = vperm.slane %v1023_v44, %v2776_v32  ;;  %v1032_v48 = vrot.slane %v1019_v39, 4  ;;  %v1035_v49 = vsel %vm600_vm8, %v1019_v39, %v1034_v37  ;;  %v1069_v50 = vsel %vm600_vm8, %v1068_v41, %v709_v22 }
 0x264   : > { %v1021_v51 = vsel %vm600_vm8, %v1020_v43, %v1002_v21  ;;  %v1043_v52 = vperm.slane %v1035_v49, %v2776_v32  ;;  %v1073_v53 = vperm.slane %v1069_v50, %v2766_v11  ;;  %v1074_v54 = vrot.slane %v1062_v45, 4 }
 0x265   : > { %v1027_v55 = vperm.slane %v1021_v51, %v2776_v32  ;;  %v1033_v56 = vsel %vm600_vm8, %v1032_v48, %v1013_v26  ;;  %v1077_v57 = vsel %vm600_vm8, %v1062_v45, %v1076_v42  ;;  %v1050_v63 = vrot.slane %v1031_v47, 4 }
 0x266   : > { %v1039_v58 = vperm.slane %v1033_v56, %v2776_v32  ;;  %v1048_v59 = vrot.slane %v1043_v52, 4  ;;  %v1075_v60 = vsel %vm600_vm8, %v1074_v54, %v1056_v31  ;;  %v1085_v61 = vperm.slane %v1077_v57, %v2776_v32 }
 0x267   : > { %v1046_v62 = vrot.slane %v1027_v55, 4  ;;  %v1081_v0 = vperm.slane %v1075_v60, %v2776_v32  ;;  %v1086_v2 = vrot.slane %v1073_v53, 4  ;;  %v1089_v6 = vsel %vm600_vm8, %v1073_v53, %v1088_v46 }
 0x268   : > { %v1044_v4 = vrot.slane %v1039_v58, 4  ;;  %v1049_v5 = vsel %vm600_vm8, %v1048_v59, %v1031_v47  ;;  %v1104_v7 = vrot.slane %v1085_v61, 4  ;;  %v1097_v10 = vperm.slane %v1089_v6, %v2776_v32 }
 0x269   : > { %v1047_v8 = vsel %vm600_vm8, %v1039_v58, %v1046_v62  ;;  %v1087_v9 = vsel %vm600_vm8, %v1086_v2, %v1067_v38  ;;  %v1100_v12 = vrot.slane %v1081_v0, 4  ;;  %v1110_v16 = vpack.c.bf16 %v1049_v5, %v1049_v5 }
 0x26a   : > { %v1045_v13 = vsel %vm600_vm8, %v1044_v4, %v1027_v55  ;;  %v1093_v14 = vperm.slane %v1087_v9, %v2776_v32  ;;  %v1108_v15 = vpack.c.bf16 %v1047_v8, %v1047_v8  ;;  %v1051_v17 = vsel %vm600_vm8, %v1043_v52, %v1050_v63 }
 0x26b   : > { %v1102_v18 = vrot.slane %v1097_v10, 4  ;;  %v1106_v19 = vpack.c.bf16 %v1045_v13, %v1045_v13  ;;  %v1105_v22 = vsel %vm600_vm8, %v1097_v10, %v1104_v7  ;;  %v1112_v27 = vpack.c.bf16 %v1051_v17, %v1051_v17  ;;  %1119 = vst.msk [vmem:[#allocation2 + $0x10] sm:$0xf] %vm1114_vm9, %v1110_v16 }
 0x26c   : > { %v1098_v20 = vrot.slane %v1093_v14, 4  ;;  %v1101_v21 = vsel %vm600_vm8, %v1093_v14, %v1100_v12  ;;  %1117 = vst.msk [vmem:[#allocation2 + $0x8] sm:$0xf] %vm1114_vm9, %v1108_v15  ;;  %v1113_v29 = vpack.c.bf16 %v1105_v22, %v1105_v22  ;;  %v2346_v31 = vunpack.i.h.bf16 %v2762_v1 }
 0x26d   : > { %v1103_v23 = vsel %vm600_vm8, %v1102_v18, %v1085_v61  ;;  %v1109_v24 = vpack.c.bf16 %v1101_v21, %v1101_v21  ;;  %1115 = vst.msk [vmem:[#allocation2] sm:$0xf] %vm1114_vm9, %v1106_v19  ;;  %v2345_v33 = vunpack.i.l.bf16 %v2762_v1  ;;  %v2351_v37 = vunpack.i.h.bf16 %v2764_v3 }
 0x26e   : > { %v1099_v25 = vsel %vm600_vm8, %v1098_v20, %v1081_v0  ;;  %v1111_v26 = vpack.c.bf16 %v1103_v23, %v1103_v23  ;;  %1121 = vst.msk [vmem:[#allocation2 + $0x18] sm:$0xf] %vm1114_vm9, %v1112_v27  ;;  %v808_v36 = vrot.slane %v2346_v31, 4  ;;  %v2350_v38 = vunpack.i.l.bf16 %v2764_v3 }
 0x26f   : > { %v1107_v28 = vpack.c.bf16 %v1099_v25, %v1099_v25  ;;  %1118 = vst.msk [vmem:[#allocation2 + $0xc] sm:$0xf] %vm1114_vm9, %v1109_v24  ;;  %v752_v39 = vrot.slane %v2345_v33, 4  ;;  %v944_v48 = vrot.slane %v2351_v37, 4 }
 0x270   : > { %1120 = vst.msk [vmem:[#allocation2 + $0x14] sm:$0xf] %vm1114_vm9, %v1111_v26  ;;  %v888_v1 = vrot.slane %v2350_v38, 4 }
 0x271   : > { %1116 = vst.msk [vmem:[#allocation2 + $0x4] sm:$0xf] %vm1114_vm9, %v1107_v28 }
 0x272   : > { %1122 = vst.msk [vmem:[#allocation2 + $0x1c] sm:$0xf] %vm1114_vm9, %v1113_v29 }
 0x286   : > { %v2369_v30 = vpop.permute.xlu2 %2368 }
 0x287   : > { %v2371_v34 = vunpack.i.h.bf16 %v2369_v30  ;;  %v2370_v35 = vunpack.i.l.bf16 %v2369_v30 }
 0x289   : > { %v806_v40 = vrot.slane %v2371_v34, 4  ;;  %v750_v41 = vrot.slane %v2370_v35, 4  ;;  %v809_v42 = vsel %vm600_vm8, %v2371_v34, %v808_v36  ;;  %v753_v44 = vsel %vm600_vm8, %v2370_v35, %v752_v39 }
 0x28a   : > { %v2866_v50 = vperm.slane %v809_v42, %v2766_v11  ;;  %v761_v52 = vperm.slane %v753_v44, %v2766_v11 }
 0x28b   : > { %v807_v49 = vsel %vm600_vm8, %v806_v40, %v2346_v31  ;;  %v751_v3 = vsel %vm600_vm8, %v750_v41, %v2345_v33 }
 0x28c   : > { %v813_v58 = vperm.slane %v807_v49, %v2766_v11  ;;  %v757_v59 = vperm.slane %v751_v3, %v2766_v11  ;;  %v844_v60 = vrot.slane %v2866_v50, 4  ;;  %v788_v62 = vrot.slane %v761_v52, 4 }
 0x28e   : > { %v832_v10 = vrot.slane %v813_v58, 4  ;;  %v776_v12 = vrot.slane %v757_v59, 4 }
 0x29e   : > { %v2374_v43 = vpop.permute.xlu0 %2373  ;;  %v2384_v47 = vpop.permute.xlu2 %2383 }
 0x29f   : > { %v2376_v45 = vunpack.i.h.bf16 %v2374_v43  ;;  %v2375_v46 = vunpack.i.l.bf16 %v2374_v43  ;;  %v2386_v53 = vunpack.i.h.bf16 %v2384_v47  ;;  %v2385_v57 = vunpack.i.l.bf16 %v2384_v47 }
 0x2a1   : > { %v942_v51 = vrot.slane %v2376_v45, 4  ;;  %v945_v54 = vsel %vm600_vm8, %v2376_v45, %v944_v48  ;;  %v886_v55 = vrot.slane %v2375_v46, 4  ;;  %v889_v56 = vsel %vm600_vm8, %v2375_v46, %v888_v1 }
 0x2a2   : > { %v2877_v63 = vperm.slane %v945_v54, %v2766_v11  ;;  %v2880_v0 = vperm.slane %v889_v56, %v2766_v11  ;;  %v818_v2 = vrot.slane %v2386_v53, 4  ;;  %v762_v7 = vrot.slane %v2385_v57, 4 }
 0x2a3   : > { %v943_v61 = vsel %vm600_vm8, %v942_v51, %v2351_v37  ;;  %v887_v6 = vsel %vm600_vm8, %v886_v55, %v2350_v38 }
 0x2a4   : > { %v2886_v13 = vperm.slane %v943_v61, %v2766_v11  ;;  %v980_v19 = vrot.slane %v2877_v63, 4  ;;  %v2893_v20 = vperm.slane %v887_v6, %v2766_v11  ;;  %v924_v23 = vrot.slane %v2880_v0, 4 }
 0x2a6   : > { %v2379_v4 = vpop.permute.xlu0 %2378  ;;  %v2882_v5 = vpop.permute.xlu1 %2388 }
 0x2a7   : > { %v2381_v8 = vunpack.i.h.bf16 %v2379_v4  ;;  %v2380_v9 = vunpack.i.l.bf16 %v2379_v4  ;;  %v2391_v14 = vunpack.i.h.bf16 %v2882_v5  ;;  %v2390_v26 = vunpack.i.l.bf16 %v2882_v5 }
 0x2a9   : > { %v820_v15 = vrot.slane %v2381_v8, 4  ;;  %v763_v16 = vsel %vm600_vm8, %v762_v7, %v2380_v9  ;;  %v764_v17 = vrot.slane %v2380_v9, 4  ;;  %v819_v18 = vsel %vm600_vm8, %v818_v2, %v2381_v8 }
 0x2aa   : > { %v769_v21 = vperm.slane %v763_v16, %v2766_v11  ;;  %v825_v22 = vperm.slane %v819_v18, %v2766_v11  ;;  %v2908_v35 = vrot.slane %v2391_v14, 4 }
 0x2ab   : > { %v765_v24 = vsel %vm600_vm8, %v2385_v57, %v764_v17  ;;  %v821_v25 = vsel %vm600_vm8, %v2386_v53, %v820_v15 }
 0x2ac   : > { %v773_v27 = vperm.slane %v765_v24, %v2766_v11  ;;  %v774_v28 = vrot.slane %v769_v21, 4  ;;  %v777_v29 = vsel %vm600_vm8, %v769_v21, %v776_v12  ;;  %v829_v30 = vperm.slane %v821_v25, %v2766_v11 }
 0x2ad   : > { %v785_v31 = vperm.slane %v777_v29, %v2776_v32  ;;  %v830_v33 = vrot.slane %v825_v22, 4  ;;  %v833_v34 = vsel %vm600_vm8, %v825_v22, %v832_v10 }
 0x2ae   : > { %v775_v36 = vsel %vm600_vm8, %v774_v28, %v757_v59  ;;  %v786_v37 = vrot.slane %v773_v27, 4  ;;  %v789_v38 = vsel %vm600_vm8, %v773_v27, %v788_v62  ;;  %v841_v39 = vperm.slane %v833_v34, %v2776_v32 }
 0x2af   : > { %v781_v40 = vperm.slane %v775_v36, %v2776_v32  ;;  %v797_v41 = vperm.slane %v789_v38, %v2776_v32  ;;  %v800_v42 = vrot.slane %v785_v31, 4  ;;  %v831_v43 = vsel %vm600_vm8, %v830_v33, %v813_v58 }
 0x2b0   : > { %v787_v44 = vsel %vm600_vm8, %v786_v37, %v761_v52  ;;  %v837_v45 = vperm.slane %v831_v43, %v2776_v32  ;;  %v842_v46 = vrot.slane %v829_v30, 4  ;;  %v845_v47 = vsel %vm600_vm8, %v829_v30, %v844_v60 }
 0x2b1   : > { %v793_v48 = vperm.slane %v787_v44, %v2776_v32  ;;  %v798_v1 = vrot.slane %v781_v40, 4  ;;  %v801_v49 = vsel %vm600_vm8, 0.0, %v800_v42  ;;  %v804_v3 = vrot.slane %v797_v41, 4 }
 0x2b2   : > { %v843_v51 = vsel %vm600_vm8, %v842_v46, %v2866_v50  ;;  %v853_v53 = vperm.slane %v845_v47, %v2776_v32  ;;  %v854_v54 = vrot.slane %v837_v45, 4  ;;  %v856_v55 = vrot.slane %v841_v39, 4 }
 0x2b3   : > { %v799_v52 = vsel %vm600_vm8, 0.0, %v798_v1  ;;  %v802_v56 = vrot.slane %v793_v48, 4  ;;  %v805_v57 = vsel %vm600_vm8, 0.0, %v804_v3  ;;  %v849_v58 = vperm.slane %v843_v51, %v2776_v32 }
 0x2b4   : > { %v855_v59 = vsel %vm600_vm8, 0.0, %v854_v54  ;;  %v857_v60 = vsel %vm600_vm8, 0.0, %v856_v55  ;;  %v860_v61 = vrot.slane %v853_v53, 4  ;;  %v1123_v62 = vsel %vm600_vm8, %v800_v42, %v781_v40 }
 0x2b5   : > { %v803_v50 = vsel %vm600_vm8, 0.0, %v802_v56  ;;  %v858_v2 = vrot.slane %v849_v58, 4  ;;  %v1127_v4 = vperm.slane %v1123_v62, %v2766_v11  ;;  %v1128_v6 = vrot.slane %v801_v49, 4 }
 0x2b6   : > { %v861_v7 = vsel %vm600_vm8, 0.0, %v860_v61  ;;  %v1134_v8 = vsel %vm600_vm8, %v804_v3, %v793_v48  ;;  %v1139_v9 = vrot.slane %v805_v57, 4  ;;  %v1177_v10 = vsel %vm600_vm8, %v856_v55, %v837_v45 }
 0x2b7   : > { %v859_v12 = vsel %vm600_vm8, 0.0, %v858_v2  ;;  %v1129_v15 = vsel %vm600_vm8, %v1128_v6, %v799_v52  ;;  %v1138_v16 = vperm.slane %v1134_v8, %v2766_v11  ;;  %v1147_v17 = vrot.slane %v1127_v4, 4 }
 0x2b8   : > { %v1133_v18 = vperm.slane %v1129_v15, %v2766_v11  ;;  %v1140_v21 = vsel %vm600_vm8, %v1139_v9, %v803_v50  ;;  %v1181_v22 = vperm.slane %v1177_v10, %v2766_v11  ;;  %v1182_v24 = vrot.slane %v857_v60, 4  ;;  %v2394_v50 = vpop.permute.xlu0 %2393 }
 0x2b9   : > { %v1144_v25 = vperm.slane %v1140_v21, %v2766_v11  ;;  %v1159_v27 = vrot.slane %v1138_v16, 4  ;;  %v1188_v28 = vsel %vm600_vm8, %v860_v61, %v849_v58  ;;  %v1193_v29 = vrot.slane %v861_v7, 4 }
 0x2ba   : > { %v1145_v30 = vrot.slane %v1133_v18, 4  ;;  %v1148_v31 = vsel %vm600_vm8, %v1133_v18, %v1147_v17  ;;  %v1183_v33 = vsel %vm600_vm8, %v1182_v24, %v855_v59  ;;  %v1192_v34 = vperm.slane %v1188_v28, %v2766_v11 }
 0x2bb   : > { %v1156_v36 = vperm.slane %v1148_v31, %v2776_v32  ;;  %v1157_v37 = vrot.slane %v1144_v25, 4  ;;  %v1160_v38 = vsel %vm600_vm8, %v1144_v25, %v1159_v27  ;;  %v1187_v39 = vperm.slane %v1183_v33, %v2766_v11 }
 0x2bc   : > { %v1146_v40 = vsel %vm600_vm8, %v1145_v30, %v1127_v4  ;;  %v1168_v41 = vperm.slane %v1160_v38, %v2776_v32  ;;  %v1194_v42 = vsel %vm600_vm8, %v1193_v29, %v859_v12  ;;  %v1201_v43 = vrot.slane %v1181_v22, 4 }
 0x2bd   : > { %v1152_v44 = vperm.slane %v1146_v40, %v2776_v32  ;;  %v1158_v45 = vsel %vm600_vm8, %v1157_v37, %v1138_v16  ;;  %v1175_v46 = vrot.slane %v1156_v36, 4  ;;  %v1198_v47 = vperm.slane %v1194_v42, %v2766_v11 }
 0x2be   : > { %v1164_v48 = vperm.slane %v1158_v45, %v2776_v32  ;;  %v1173_v1 = vrot.slane %v1168_v41, 4  ;;  %v1199_v49 = vrot.slane %v1187_v39, 4  ;;  %v1202_v3 = vsel %vm600_vm8, %v1187_v39, %v1201_v43 }
 0x2bf   : > { %v1171_v51 = vrot.slane %v1152_v44, 4  ;;  %v1176_v53 = vsel %vm600_vm8, %v1168_v41, %v1175_v46  ;;  %v1210_v54 = vperm.slane %v1202_v3, %v2776_v32  ;;  %v1211_v55 = vrot.slane %v1198_v47, 4 }
 0x2c0   : > { %v1169_v52 = vrot.slane %v1164_v48, 4  ;;  %v1174_v56 = vsel %vm600_vm8, %v1173_v1, %v1156_v36  ;;  %v1200_v57 = vsel %vm600_vm8, %v1199_v49, %v1181_v22  ;;  %v1213_v58 = vrot.slane %v1192_v34, 4 }
 0x2c1   : > { %v1172_v59 = vsel %vm600_vm8, %v1164_v48, %v1171_v51  ;;  %v1206_v60 = vperm.slane %v1200_v57, %v2776_v32  ;;  %v1212_v61 = vsel %vm600_vm8, %v1211_v55, %v1192_v34  ;;  %v1229_v62 = vrot.slane %v1210_v54, 4 }
 0x2c2   : > { %v1170_v2 = vsel %vm600_vm8, %v1169_v52, %v1152_v44  ;;  %v1214_v4 = vsel %vm600_vm8, %v1198_v47, %v1213_v58  ;;  %v1218_v6 = vperm.slane %v1212_v61, %v2776_v32  ;;  %v1233_v7 = vpack.c.bf16 %v1172_v59, %v1172_v59 }
 0x2c3   : > { %v1222_v8 = vperm.slane %v1214_v4, %v2776_v32  ;;  %v1225_v9 = vrot.slane %v1206_v60, 4  ;;  %v1231_v10 = vpack.c.bf16 %v1170_v2, %v1170_v2  ;;  %v1235_v12 = vpack.c.bf16 %v1174_v56, %v1174_v56 }
 0x2c4   : > { %v1223_v15 = vrot.slane %v1218_v6, 4  ;;  %v1237_v16 = vpack.c.bf16 %v1176_v53, %v1176_v53  ;;  %1241 = vst.msk [vmem:[#allocation3 + $0x8] sm:$0xf] %vm1114_vm9, %v1233_v7  ;;  %v2396_v17 = vunpack.i.h.bf16 %v2394_v50  ;;  %v2395_v18 = vunpack.i.l.bf16 %v2394_v50 }
 0x2c5   : > { %v1226_v21 = vsel %vm600_vm8, %v1218_v6, %v1225_v9  ;;  %v1227_v22 = vrot.slane %v1222_v8, 4  ;;  %v1230_v24 = vsel %vm600_vm8, %v1222_v8, %v1229_v62  ;;  %1239 = vst.msk [vmem:[#allocation3] sm:$0xf] %vm1114_vm9, %v1231_v10  ;;  %v900_v25 = vrot.slane %v2390_v26, 4 }
 0x2c6   : > { %v1224_v27 = vsel %vm600_vm8, %v1223_v15, %v1206_v60  ;;  %v1234_v28 = vpack.c.bf16 %v1226_v21, %v1226_v21  ;;  %v1238_v29 = vpack.c.bf16 %v1230_v24, %v1230_v24  ;;  %1243 = vst.msk [vmem:[#allocation3 + $0x10] sm:$0xf] %vm1114_vm9, %v1235_v12  ;;  %v954_v30 = vrot.slane %v2396_v17, 4 }
 0x2c7   : > { %v1228_v31 = vsel %vm600_vm8, %v1227_v22, %v1210_v54  ;;  %v1232_v33 = vpack.c.bf16 %v1224_v27, %v1224_v27  ;;  %1245 = vst.msk [vmem:[#allocation3 + $0x18] sm:$0xf] %vm1114_vm9, %v1237_v16  ;;  %v898_v34 = vrot.slane %v2395_v18, 4  ;;  %v901_v36 = vsel %vm600_vm8, %v2395_v18, %v900_v25 }
 0x2c8   : > { %v1236_v37 = vpack.c.bf16 %v1228_v31, %v1228_v31  ;;  %1242 = vst.msk [vmem:[#allocation3 + $0xc] sm:$0xf] %vm1114_vm9, %v1234_v28  ;;  %v909_v38 = vperm.slane %v901_v36, %v2766_v11  ;;  %v955_v39 = vsel %vm600_vm8, %v954_v30, %v2391_v14  ;;  %v957_v40 = vsel %vm600_vm8, %v2396_v17, %v2908_v35 }
 0x2c9   : > { %v968_v41 = vrot.slane %v2886_v13, 4  ;;  %1240 = vst.msk [vmem:[#allocation3 + $0x4] sm:$0xf] %vm1114_vm9, %v1232_v33  ;;  %v899_v42 = vsel %vm600_vm8, %v898_v34, %v2390_v26  ;;  %v961_v43 = vperm.slane %v955_v39, %v2766_v11  ;;  %v965_v44 = vperm.slane %v957_v40, %v2766_v11 }
 0x2ca   : > { %v912_v45 = vrot.slane %v2893_v20, 4  ;;  %1244 = vst.msk [vmem:[#allocation3 + $0x14] sm:$0xf] %vm1114_vm9, %v1236_v37  ;;  %v905_v14 = vperm.slane %v899_v42, %v2766_v11  ;;  %v922_v46 = vrot.slane %v909_v38, 4  ;;  %v925_v35 = vsel %vm600_vm8, %v909_v38, %v924_v23 }
 0x2cb   : > { %1246 = vst.msk [vmem:[#allocation3 + $0x1c] sm:$0xf] %vm1114_vm9, %v1238_v29  ;;  %v933_v5 = vperm.slane %v925_v35, %v2776_v32  ;;  %v966_v26 = vrot.slane %v961_v43, 4  ;;  %v969_v47 = vsel %vm600_vm8, %v961_v43, %v968_v41  ;;  %v978_v48 = vrot.slane %v965_v44, 4 }
 0x2cc   : > { %v910_v1 = vrot.slane %v905_v14, 4  ;;  %v913_v49 = vsel %vm600_vm8, %v905_v14, %v912_v45  ;;  %v923_v3 = vsel %vm600_vm8, %v922_v46, %v2880_v0  ;;  %v977_v51 = vperm.slane %v969_v47, %v2776_v32 }
 0x2cd   : > { %v921_v53 = vperm.slane %v913_v49, %v2776_v32  ;;  %v929_v23 = vperm.slane %v923_v3, %v2776_v32  ;;  %v940_v54 = vrot.slane %v933_v5, 4  ;;  %v967_v55 = vsel %vm600_vm8, %v966_v26, %v2886_v13 }
 0x2ce   : > { %v911_v52 = vsel %vm600_vm8, %v910_v1, %v2893_v20  ;;  %v973_v56 = vperm.slane %v967_v55, %v2776_v32  ;;  %v979_v57 = vsel %vm600_vm8, %v978_v48, %v2877_v63  ;;  %v981_v0 = vsel %vm600_vm8, %v965_v44, %v980_v19 }
 0x2cf   : > { %v917_v58 = vperm.slane %v911_v52, %v2776_v32  ;;  %v936_v59 = vrot.slane %v921_v53, 4  ;;  %v938_v60 = vrot.slane %v929_v23, 4  ;;  %v941_v61 = vsel %vm600_vm8, 0.0, %v940_v54 }
 0x2d0   : > { %v985_v13 = vperm.slane %v979_v57, %v2776_v32  ;;  %v989_v62 = vperm.slane %v981_v0, %v2776_v32  ;;  %v990_v20 = vrot.slane %v973_v56, 4  ;;  %v992_v50 = vrot.slane %v977_v51, 4 }
 0x2d1   : > { %v934_v2 = vrot.slane %v917_v58, 4  ;;  %v937_v4 = vsel %vm600_vm8, 0.0, %v936_v59  ;;  %v939_v6 = vsel %vm600_vm8, 0.0, %v938_v60  ;;  %v1247_v63 = vsel %vm600_vm8, %v936_v59, %v917_v58 }
 0x2d2   : > { %v991_v19 = vsel %vm600_vm8, 0.0, %v990_v20  ;;  %v993_v7 = vsel %vm600_vm8, 0.0, %v992_v50  ;;  %v994_v8 = vrot.slane %v985_v13, 4  ;;  %v996_v9 = vrot.slane %v989_v62, 4 }
 0x2d3   : > { %v935_v10 = vsel %vm600_vm8, 0.0, %v934_v2  ;;  %v1251_v12 = vperm.slane %v1247_v63, %v2766_v11  ;;  %v1252_v15 = vrot.slane %v937_v4, 4  ;;  %v1258_v16 = vsel %vm600_vm8, %v940_v54, %v929_v23 }
 0x2d4   : > { %v995_v17 = vsel %vm600_vm8, 0.0, %v994_v8  ;;  %v997_v18 = vsel %vm600_vm8, 0.0, %v996_v9  ;;  %v1262_v21 = vperm.slane %v1258_v16, %v2766_v11  ;;  %v1263_v22 = vrot.slane %v941_v61, 4 }
 0x2d5   : > { %v1253_v24 = vsel %vm600_vm8, %v1252_v15, %v935_v10  ;;  %v1271_v25 = vrot.slane %v1251_v12, 4  ;;  %v1301_v27 = vsel %vm600_vm8, %v992_v50, %v973_v56  ;;  %v1306_v28 = vrot.slane %v993_v7, 4 }
 0x2d6   : > { %v1257_v29 = vperm.slane %v1253_v24, %v2766_v11  ;;  %v1264_v30 = vsel %vm600_vm8, %v1263_v22, %v939_v6  ;;  %v1283_v31 = vrot.slane %v1262_v21, 4  ;;  %v1305_v33 = vperm.slane %v1301_v27, %v2766_v11 }
 0x2d7   : > { %v1268_v34 = vperm.slane %v1264_v30, %v2766_v11  ;;  %v1307_v36 = vsel %vm600_vm8, %v1306_v28, %v991_v19  ;;  %v1312_v37 = vsel %vm600_vm8, %v996_v9, %v985_v13  ;;  %v1317_v38 = vrot.slane %v997_v18, 4 }
 0x2d8   : > { %v1269_v39 = vrot.slane %v1257_v29, 4  ;;  %v1272_v40 = vsel %vm600_vm8, %v1257_v29, %v1271_v25  ;;  %v1311_v41 = vperm.slane %v1307_v36, %v2766_v11  ;;  %v1316_v42 = vperm.slane %v1312_v37, %v2766_v11 }
 0x2d9   : > { %v1280_v43 = vperm.slane %v1272_v40, %v2776_v32  ;;  %v1281_v44 = vrot.slane %v1268_v34, 4  ;;  %v1284_v45 = vsel %vm600_vm8, %v1268_v34, %v1283_v31  ;;  %v1318_v14 = vsel %vm600_vm8, %v1317_v38, %v995_v17 }
 0x2da   : > { %v1270_v46 = vsel %vm600_vm8, %v1269_v39, %v1251_v12  ;;  %v1292_v35 = vperm.slane %v1284_v45, %v2776_v32  ;;  %v1322_v5 = vperm.slane %v1318_v14, %v2766_v11  ;;  %v1323_v26 = vrot.slane %v1311_v41, 4 }
 0x2db   : > { %v1276_v47 = vperm.slane %v1270_v46, %v2776_v32  ;;  %v1282_v48 = vsel %vm600_vm8, %v1281_v44, %v1262_v21  ;;  %v1299_v1 = vrot.slane %v1280_v43, 4  ;;  %v1325_v49 = vrot.slane %v1305_v33, 4 }
 0x2dc   : > { %v1288_v3 = vperm.slane %v1282_v48, %v2776_v32  ;;  %v1297_v51 = vrot.slane %v1292_v35, 4  ;;  %v1324_v53 = vsel %vm600_vm8, %v1323_v26, %v1305_v33  ;;  %v1335_v23 = vrot.slane %v1322_v5, 4 }
 0x2dd   : > { %v1295_v54 = vrot.slane %v1276_v47, 4  ;;  %v1300_v55 = vsel %vm600_vm8, %v1292_v35, %v1299_v1  ;;  %v1326_v52 = vsel %vm600_vm8, %v1311_v41, %v1325_v49  ;;  %v1330_v11 = vperm.slane %v1324_v53, %v2776_v32 }
 0x2de   : > { %v1293_v56 = vrot.slane %v1288_v3, 4  ;;  %v1298_v57 = vsel %vm600_vm8, %v1297_v51, %v1280_v43  ;;  %v1334_v0 = vperm.slane %v1326_v52, %v2776_v32  ;;  %v1336_v58 = vsel %vm600_vm8, %v1335_v23, %v1316_v42 }
 0x2df   : > { %v1296_v59 = vsel %vm600_vm8, %v1288_v3, %v1295_v54  ;;  %v1337_v60 = vrot.slane %v1316_v42, 4  ;;  %v1342_v61 = vperm.slane %v1336_v58, %v2776_v32  ;;  %v1349_v13 = vrot.slane %v1330_v11, 4 }
 0x2e0   : > { %v1294_v62 = vsel %vm600_vm8, %v1293_v56, %v1276_v47  ;;  %v1353_v20 = vrot.slane %v1334_v0, 4  ;;  %v1357_v50 = vpack.c.bf16 %v1296_v59, %v1296_v59  ;;  %v1359_v2 = vpack.c.bf16 %v1298_v57, %v1298_v57 }
 0x2e1   : > { %v1338_v4 = vsel %vm600_vm8, %v1322_v5, %v1337_v60  ;;  %v1347_v6 = vrot.slane %v1342_v61, 4  ;;  %v1350_v63 = vsel %vm600_vm8, %v1342_v61, %v1349_v13  ;;  %v1355_v19 = vpack.c.bf16 %v1294_v62, %v1294_v62 }
 0x2e2   : > { %v1346_v7 = vperm.slane %v1338_v4, %v2776_v32  ;;  %v1358_v8 = vpack.c.bf16 %v1350_v63, %v1350_v63  ;;  %1365 = vst.msk [vmem:[#allocation4 + $0x8] sm:$0xf] %vm1114_vm9, %v1357_v50  ;;  %v1361_v10 = vpack.c.bf16 %v1300_v55, %v1300_v55 }
 0x2e3   : > { %v1348_v9 = vsel %vm600_vm8, %v1347_v6, %v1330_v11  ;;  %1363 = vst.msk [vmem:[#allocation4] sm:$0xf] %vm1114_vm9, %v1355_v19 }
 0x2e4   : > { %v1351_v12 = vrot.slane %v1346_v7, 4  ;;  %v1354_v15 = vsel %vm600_vm8, %v1346_v7, %v1353_v20  ;;  %v1356_v16 = vpack.c.bf16 %v1348_v9, %v1348_v9  ;;  %1366 = vst.msk [vmem:[#allocation4 + $0xc] sm:$0xf] %vm1114_vm9, %v1358_v8 }
 0x2e5   : > { %v1362_v17 = vpack.c.bf16 %v1354_v15, %v1354_v15  ;;  %1367 = vst.msk [vmem:[#allocation4 + $0x10] sm:$0xf] %vm1114_vm9, %v1359_v2 }
 0x2e6   : > { %v1352_v18 = vsel %vm600_vm8, %v1351_v12, %v1334_v0  ;;  %1364 = vst.msk [vmem:[#allocation4 + $0x4] sm:$0xf] %vm1114_vm9, %v1356_v16 }
 0x2e7   : > { %v1360_v32 = vpack.c.bf16 %v1352_v18, %v1352_v18  ;;  %1369 = vst.msk [vmem:[#allocation4 + $0x18] sm:$0xf] %vm1114_vm9, %v1361_v10 }
 0x2e8   : > { %1370 = vst.msk [vmem:[#allocation4 + $0x1c] sm:$0xf] %vm1114_vm9, %v1362_v17 }
 0x2e9   : > { %1368 = vst.msk [vmem:[#allocation4 + $0x14] sm:$0xf] %vm1114_vm9, %v1360_v32 }
 0x2ea PF: > { %v2210_v21 = vld [vmem:[#allocation3] sm:$0xff]  ;;  %vm1395_vm10 = vcmask 64512   ;;  %v2212_v22 = vld [vmem:[#allocation3 + $0x10] sm:$0xff]  ;;  %s2110_s13 = sshll.u32 %s2545_s28, 3  ;;  %v2213_v24 = vld [vmem:[#allocation3 + $0x18] sm:$0xff]  ;;  %vm1487_vm11 = vcmask 130048  }
 0x2eb   : > { %s1374_s12 = sshra.s32 %s2110_s13, 3  ;;  %v2211_v25 = vld [vmem:[#allocation3 + $0x8] sm:$0xff]  ;;  %v1400_v27 = vsel %vm1395_vm10, %v2210_v21, 0  ;;  %v1448_v28 = vsel %vm1395_vm10, %v2212_v22, 0  ;;  %v1472_v29 = vsel %vm1395_vm10, %v2213_v24, 0  ;;  %vm1633_vm12 = vcmask 1047556  }
 0x2ec   : > { %s2111_s25 = sshll.u32 %s1374_s12, 2  ;;  %1409 = vmatpush.bf16.xpose.msra.mxu0 %v1400_v27  ;;  %1457 = vmatpush.bf16.xpose.msra.mxu3 %v1448_v28  ;;  %v1424_v30 = vsel %vm1395_vm10, %v2211_v25, 0  ;;  %v2215_v62 = vld [vmem:[#allocation4 + $0x8] sm:$0xff]  ;;  %v2572_v28 = vmov 1983009808   ;;  %s2574_s18 = smov 16  }
 0x2ed   : > { %1433 = vmatpush.bf16.xpose.msra.mxu1 %v1424_v30  ;;  %s1377_s16 = scalar_lea.vmem [#allocation2], %s2111_s25  ;;  %v2214_v61 = vld [vmem:[#allocation4] sm:$0xff]  ;;  %s2575_s20 = smov 24   ;;  %vm1757_vm13 = vcmask 195584   ;;  %vm1780_vm14 = vcmask 261120  }
 0x2ee   : > { %v1378_v31 = vld [vmem:[%s1377_s16] sm:$0xf]  ;;  %v1380_v33 = vld [vmem:[%s1377_s16 + $0x10] sm:$0xf]  ;;  %v1379_v34 = vld [vmem:[%s1377_s16 + $0x8] sm:$0xf] }
 0x2ef   : > { %v1381_v36 = vld [vmem:[%s1377_s16 + $0x18] sm:$0xf]  ;;  %s2576_s21 = smov 8   ;;  %s3278_s16 = sld [smem:[#allocation20_spill]] }
 0x2f0   : > { %v2216_v13 = vld [vmem:[#allocation4 + $0x10] sm:$0xff]  ;;  %v2217_v20 = vld [vmem:[#allocation4 + $0x18] sm:$0xff]  ;;  %s3281_s2 = scalar_lea.vmem [#allocation8], %s2727_s30 }
 0x2f1   : > { %1604 = vmatpush.bf16.msra.mxu2 %v2216_v13  ;;  %s1999_s3 = sshll.u32 %s3281_s2, 4  ;;  %s2000_s3 = int_to_ptr.vmem [resolvable:$true] %s1999_s3 }
 0x2f3   : > { %2116 = vmatmul.msk.bf16.vlgmr.msra.gmra.mxu0 %vm1395_vm10, %v1378_v31  ;;  %2126 = vmatmul.msk.bf16.vlgmr.msra.gmra.mxu3 %vm1395_vm10, %v1380_v33 }
 0x2f4   : > { %1481 = vmatpush.bf16.xpose.msrb.mxu3 %v1472_v29  ;;  %2121 = vmatmul.msk.bf16.vlgmr.msra.gmra.mxu1 %vm1395_vm10, %v1379_v34  ;;  %v1638_v29 = vunpack.c.l.s4 %v2572_v28 }
 0x2f5   : > { %1560 = vmatpush.bf16.msrb.mxu0 %v2214_v61  ;;  %1582 = vmatpush.bf16.msrb.mxu1 %v2215_v62 }
 0x2f6   : > { %v1639_v34 = vunpack.c.0.s8 %v1638_v29 }
 0x2fc   : > { %1626 = vmatpush.bf16.msra.mxu3 %v2217_v20 }
 0x303   : > { %2131 = vmatmul.msk.bf16.vlgmr.msrb.gmra.mxu3 %vm1395_vm10, %v1381_v36 }
 0x370   : > { %v1411_v37 = vpop.f32.mrf.mxu0 }
 0x371   : > { %v1488_v38 = vsel %vm1487_vm11, %v1411_v37, -inf  ;;  %v1435_v39 = vpop.f32.mrf.mxu1 }
 0x372   : > { %1489 = vmax.xlane.f32.xlu1 %v1488_v38  ;;  %v1491_v42 = vsel %vm1487_vm11, %v1435_v39, -inf  ;;  %v2573_v38 = vmov 1934713408  }
 0x376   : > { %v1459_v40 = vpop.f32.mrf.mxu3 }
 0x377   : > { %v1494_v41 = vsel %vm1487_vm11, %v1459_v40, -inf }
 0x378   : > { %1495 = vmax.xlane.f32.xlu0 %v1494_v41  ;;  %v1413_v43 = vpop.f32.mrf.mxu0 }
 0x379   : > { %v1437_v44 = vpop.f32.mrf.mxu1 }
 0x37a   : > { %1492 = vmax.xlane.f32.xlu1 %v1491_v42 }
 0x37e   : > { %v1461_v45 = vpop.f32.mrf.mxu3 }
 0x386   : > { %v1483_v14 = vpop.f32.mrf.mxu3 }
 0x387   : > { %v1497_v46 = vsel %vm1487_vm11, %v1483_v14, -inf }
 0x388   : > { %1498 = vmax.xlane.f32.xlu0 %v1497_v46 }
 0x38e   : > { %v1485_v35 = vpop.f32.mrf.mxu3 }
 0x3e5   : > { %v1490_v5 = vpop.xlane.xlu1 %1489 }
 0x3e6   : > { %v1500_v26 = vsub.f32 %v1411_v37, %v1490_v5 }
 0x3e8   : > { %v1504_v47 = vmul.f32 1.442695, %v1500_v26 }
 0x3ea   : > { %2409 = vpow2.f32 %v1504_v47 }
 0x3eb   : > { %v1496_v48 = vpop.xlane.xlu0 %1495 }
 0x3ec   : > { %v1502_v1 = vsub.f32 %v1459_v40, %v1496_v48 }
 0x3ed   : > { %v1493_v49 = vpop.xlane.xlu1 %1492 }
 0x3ee   : > { %v1508_v3 = vmul.f32 1.442695, %v1502_v1  ;;  %v1501_v51 = vsub.f32 %v1435_v39, %v1493_v49  ;;  %v1662_v39 = vunpack.c.l.s4 %v2573_v38  ;;  %v2218_v38 = vld [vmem:[%s3244_s5] sm:$0xff] }
 0x3f0   : > { %v2410_v53 = vpop.eup %2409  ;;  %2411 = vpow2.f32 %v1508_v3  ;;  %v1506_v23 = vmul.f32 1.442695, %v1501_v51 }
 0x3f1   : > { %v1512_v54 = vsel %vm1487_vm11, %v2410_v53, 0.0 }
 0x3f2   : > { %2413 = vpow2.f32 %v1506_v23  ;;  %1513 = vadd.xlane.f32.xlu0 %v1512_v54 }
 0x3f6   : > { %v2412_v55 = vpop.eup %2411 }
 0x3f7   : > { %v1518_v52 = vsel %vm1487_vm11, %v2412_v55, 0.0 }
 0x3f8   : > { %v2414_v11 = vpop.eup %2413  ;;  %1519 = vadd.xlane.f32.xlu2 %v1518_v52 }
 0x3f9   : > { %v1515_v56 = vsel %vm1487_vm11, %v2414_v11, 0.0 }
 0x3fa   : > { %1516 = vadd.xlane.f32.xlu1 %v1515_v56 }
 0x3fb   : > { %v1499_v57 = vpop.xlane.xlu0 %1498 }
 0x3fc   : > { %v1503_v0 = vsub.f32 %v1483_v14, %v1499_v57  ;;  %v1663_v14 = vunpack.c.0.s8 %v1662_v39 }
 0x3fe   : > { %v1510_v58 = vmul.f32 1.442695, %v1503_v0 }
 0x400   : > { %2415 = vpow2.f32 %v1510_v58 }
 0x406   : > { %v2416_v59 = vpop.eup %2415 }
 0x407   : > { %v1521_v60 = vsel %vm1487_vm11, %v2416_v59, 0.0 }
 0x408   : > { %1522 = vadd.xlane.f32.xlu2 %v1521_v60 }
 0x465   : > { %v1514_v50 = vpop.xlane.xlu0 %1513 }
 0x466   : > { %2417 = vrcp.f32 %v1514_v50 }
 0x46b   : > { %v1520_v2 = vpop.xlane.xlu2 %1519 }
 0x46c   : > { %v2418_v4 = vpop.eup %2417  ;;  %2419 = vrcp.f32 %v1520_v2 }
 0x46d   : > { %v1528_v6 = vmul.f32 %v2418_v4, %v2410_v53  ;;  %v1517_v63 = vpop.xlane.xlu1 %1516 }
 0x46e   : > { %2421 = vrcp.f32 %v1517_v63 }
 0x46f   : > { %v1532_v19 = vpack.c.bf16 %v1528_v6, %v1528_v6 }
 0x471   : > { %2136 = vmatmul.msk.bf16.vlgmr.msrb.gmra.mxu0 %vm1487_vm11, %v1532_v19 }
 0x472   : > { %v2420_v7 = vpop.eup %2419 }
 0x473   : > { %v1530_v8 = vmul.f32 %v2420_v7, %v2412_v55 }
 0x474   : > { %v2422_v9 = vpop.eup %2421 }
 0x475   : > { %v1529_v10 = vmul.f32 %v2422_v9, %v2414_v11  ;;  %v1534_v12 = vpack.c.bf16 %v1530_v8, %v1530_v8 }
 0x477   : > { %2146 = vmatmul.msk.bf16.vlgmr.msra.gmra.mxu2 %vm1487_vm11, %v1534_v12  ;;  %v1533_v15 = vpack.c.bf16 %v1529_v10, %v1529_v10 }
 0x479   : > { %2141 = vmatmul.msk.bf16.vlgmr.msrb.gmra.mxu1 %vm1487_vm11, %v1533_v15 }
 0x47b   : > { %v1523_v16 = vpop.xlane.xlu2 %1522 }
 0x47c   : > { %2423 = vrcp.f32 %v1523_v16 }
 0x482   : > { %v2424_v17 = vpop.eup %2423 }
 0x483   : > { %v1531_v18 = vmul.f32 %v2424_v17, %v2416_v59 }
 0x485   : > { %v1535_v32 = vpack.c.bf16 %v1531_v18, %v1531_v18 }
 0x487   : > { %2151 = vmatmul.msk.bf16.vlgmr.msra.gmra.mxu3 %vm1487_vm11, %v1535_v32 }
 0x4ee   : > { %v1562_v21 = vpop.f32.mrf.mxu0 }
 0x4ef   : > { %v1635_v31 = vrot.slane %v1562_v21, 4 }
 0x4f6   : > { %v1564_v22 = vpop.f32.mrf.mxu0  ;;  %v1584_v24 = vpop.f32.mrf.mxu1 }
 0x4f7   : > { %v1647_v41 = vrot.slane %v1584_v24, 4 }
 0x4fa   : > { %v1606_v25 = vpop.f32.mrf.mxu2 }
 0x4fb   : > { %v1632_v33 = vrot.slane %v1606_v25, 4  ;;  %v1636_v36 = vsel %vm1633_vm12, %v1606_v25, %v1635_v31 }
 0x4fc   : > { %v1644_v40 = vperm.slane %v1636_v36, %v1639_v34 }
 0x4fd   : > { %v1634_v37 = vsel %vm1633_vm12, %v1632_v33, %v1562_v21 }
 0x4fe   : > { %v1586_v27 = vpop.f32.mrf.mxu1  ;;  %v1640_v42 = vperm.slane %v1634_v37, %v1639_v34  ;;  %v1671_v46 = vrot.slane %v1644_v40, 4  ;;  %v2219_v37 = vld [vmem:[%s3244_s5 + $0x8] sm:$0xff] }
 0x4ff   : > { %1790 = vmatpush.bf16.msra.mxu0 %v2219_v37 }
 0x500   : > { %v1659_v26 = vrot.slane %v1640_v42, 4 }
 0x502   : > { %v1608_v30 = vpop.f32.mrf.mxu2 }
 0x503   : > { %1791 = vmatpush.bf16.msra.mxu0 %v2218_v38 }
 0x50a   : > { %v1628_v43 = vpop.f32.mrf.mxu3 }
 0x50b   : > { %v1645_v44 = vrot.slane %v1628_v43, 4  ;;  %v1648_v45 = vsel %vm1633_vm12, %v1628_v43, %v1647_v41 }
 0x50c   : > { %v1656_v35 = vperm.slane %v1648_v45, %v1639_v34 }
 0x50d   : > { %v1646_v5 = vsel %vm1633_vm12, %v1645_v44, %v1584_v24 }
 0x50e   : > { %v1652_v47 = vperm.slane %v1646_v5, %v1639_v34  ;;  %v1669_v48 = vrot.slane %v1656_v35, 4  ;;  %v1672_v1 = vsel %vm1633_vm12, %v1656_v35, %v1671_v46 }
 0x50f   : > { %v1680_v49 = vperm.slane %v1672_v1, %v1663_v14  ;;  %v2577_v1 = vmov 32.0  }
 0x510   : > { %v1657_v3 = vrot.slane %v1652_v47, 4  ;;  %v1660_v51 = vsel %vm1633_vm12, %v1652_v47, %v1659_v26  ;;  %v1670_v53 = vsel %vm1633_vm12, %v1669_v48, %v1644_v40  ;;  %2425 = vrcp.f32 %v2577_v1 }
 0x511   : > { %v1668_v23 = vperm.slane %v1660_v51, %v1663_v14  ;;  %v1676_v54 = vperm.slane %v1670_v53, %v1663_v14  ;;  %v1687_v55 = vrot.slane %v1680_v49, 4 }
 0x512   : > { %v1658_v52 = vsel %vm1633_vm12, %v1657_v3, %v1640_v42  ;;  %v1630_v11 = vpop.f32.mrf.mxu3 }
 0x513   : > { %v1664_v56 = vperm.slane %v1658_v52, %v1663_v14  ;;  %v1683_v57 = vrot.slane %v1668_v23, 4  ;;  %v1685_v0 = vrot.slane %v1676_v54, 4  ;;  %v1688_v58 = vsel %vm1633_vm12, 0.0, %v1687_v55 }
 0x514   : > { %v1700_v59 = vsel %vm1633_vm12, %v1687_v55, %v1676_v54  ;;  %v1705_v60 = vrot.slane %v1688_v58, 4  ;;  %v2220_v58 = vld [vmem:[%s3248_s9] sm:$0xff] }
 0x515   : > { %v1681_v61 = vrot.slane %v1664_v56, 4  ;;  %v1684_v13 = vsel %vm1633_vm12, 0.0, %v1683_v57  ;;  %v1686_v62 = vsel %vm1633_vm12, 0.0, %v1685_v0  ;;  %v1704_v20 = vperm.slane %v1700_v59, %v1639_v34  ;;  %v2221_v0 = vld [vmem:[%s3248_s9 + $0x8] sm:$0xff] }
 0x516   : > { %v1694_v50 = vrot.slane %v1684_v13, 4  ;;  %v1689_v2 = vsel %vm1633_vm12, %v1683_v57, %v1664_v56  ;;  %v1706_v4 = vsel %vm1633_vm12, %v1705_v60, %v1686_v62  ;;  %v2426_v49 = vpop.eup %2425  ;;  %1867 = vmatpush.bf16.msra.mxu1 %v2221_v0 }
 0x517   : > { %v1682_v6 = vsel %vm1633_vm12, 0.0, %v1681_v61  ;;  %v1693_v63 = vperm.slane %v1689_v2, %v1639_v34  ;;  %v1710_v19 = vperm.slane %v1706_v4, %v1639_v34  ;;  %v1725_v7 = vrot.slane %v1704_v20, 4 }
 0x518   : > { %v1695_v8 = vsel %vm1633_vm12, %v1694_v50, %v1682_v6  ;;  %v1804_v3 = vmul.f32 32.0, %v2426_v49  ;;  %vm1808_vm15 = vweird.f32 %v2426_v49  ;;  %v2405_v6 = vld [vmem:[%s3246_s7] ss:$0 sm:$0xff] }
 0x519   : > { %v1699_v9 = vperm.slane %v1695_v8, %v1639_v34  ;;  %v1713_v10 = vrot.slane %v1693_v63, 4  ;;  %v1726_v12 = vsel %vm1633_vm12, %v1710_v19, %v1725_v7  ;;  %v1723_v15 = vrot.slane %v1710_v19, 4  ;;  %v2406_v7 = vld [vmem:[%s3247_s8] ss:$0 sm:$0xff] }
 0x51a   : > { %v1734_v16 = vperm.slane %v1726_v12, %v1663_v14  ;;  %v1805_v51 = vsub.f32 1.0, %v1804_v3  ;;  %1868 = vmatpush.bf16.msra.mxu1 %v2220_v58  ;;  %v2229_v12 = vld [vmem:[%s3250_s11 + $0x38] sm:$0xff] }
 0x51b   : > { %v1714_v17 = vsel %vm1633_vm12, %v1699_v9, %v1713_v10  ;;  %v1711_v18 = vrot.slane %v1699_v9, 4  ;;  %v1724_v32 = vsel %vm1633_vm12, %v1723_v15, %v1704_v20  ;;  %1969 = vmatpush.bf16.msrb.mxu2 %v2229_v12  ;;  %v2228_v15 = vld [vmem:[%s3250_s11 + $0x30] sm:$0xff] }
 0x51c   : > { %v1722_v21 = vperm.slane %v1714_v17, %v1663_v14  ;;  %v1739_v22 = vrot.slane %v1734_v16, 4  ;;  %v1730_v24 = vperm.slane %v1724_v32, %v1663_v14  ;;  %v1806_v53 = vmul.f32 %v2426_v49, %v1805_v51  ;;  %v2226_v17 = vld [vmem:[%s3250_s11 + $0x20] sm:$0xff] }
 0x51d   : > { %v1712_v25 = vsel %vm1633_vm12, %v1711_v18, %v1693_v63  ;;  %v2407_v18 = vld [vmem:[%s3249_s10] ss:$0 sm:$0xff] }
 0x51e   : > { %v1740_v27 = vsel %vm1633_vm12, %v1739_v22, %v1722_v21  ;;  %v1741_v28 = vrot.slane %v1722_v21, 4  ;;  %v1718_v29 = vperm.slane %v1712_v25, %v1663_v14  ;;  %v1735_v30 = vrot.slane %v1730_v24, 4  ;;  %v2404_v14 = vld [vmem:[%s3245_s6] ss:$0 sm:$0xff]  ;;  %v2225_v21 = vld [vmem:[%s3250_s11 + $0x18] sm:$0xff]  ;;  %v2224_v25 = vld [vmem:[%s3250_s11 + $0x10] sm:$0xff] }
 0x51f   : > { %1748 = vrot.lane.b32.xlu0 %v1740_v27, %s2574_s18  ;;  %v1807_v23 = vadd.f32 %v2426_v49, %v1806_v53  ;;  %1970 = vmatpush.bf16.msrb.mxu2 %v2228_v15 }
 0x520   : > { %v1742_v31 = vsel %vm1633_vm12, %v1734_v16, %v1741_v28  ;;  %v1737_v33 = vrot.slane %v1718_v29, 4  ;;  %v1736_v34 = vsel %vm1633_vm12, %v1735_v30, %v1718_v29  ;;  %v2227_v16 = vld [vmem:[%s3250_s11 + $0x28] sm:$0xff] }
 0x521   : > { %1752 = vrot.lane.b32.xlu1 %v1742_v31, %s2575_s20  ;;  %s1372_s20 = scalar_lea.vmem %s2733_s22, %s2110_s13  ;;  %v1809_v54 = vsel %vm1808_vm15, %v2426_v49, %v1807_v23  ;;  %v2223_v30 = vld [vmem:[%s3250_s11 + $0x8] sm:$0xff] }
 0x522   : > { %v1738_v36 = vsel %vm1633_vm12, %v1730_v24, %v1737_v33  ;;  %v1373_v46 = vld [vmem:[%s1372_s20] sm:$0xff]  ;;  %s3280_s20 = sld [smem:[#allocation21_spill]] }
 0x523   : > { %1744 = vrot.lane.b32.xlu2 %v1738_v36, %s2576_s21  ;;  %1971 = vmatpush.bf16.msrb.mxu2 %v2227_v16  ;;  %v2222_v33 = vld [vmem:[%s3250_s11] sm:$0xff]  ;;  %s2203_s21 = sshll.u32 %s2549_s29, 1  ;;  %s3283_s29 = sand.u32 1, %s2537_s26  }
 0x524   : > { %s1995_s12 = sadd.s32 %s2545_s28, %s2203_s21  ;;  %s3282_s28 = smov %s3281_s2 }
 0x525   : > { %s2204_s22 = sshll.u32 %s1995_s12, 3  ;;  %s1985_s21 = scalar_lea.sflag [#allocation7], %s3283_s29 }
 0x527   : > { %1972 = vmatpush.bf16.msrb.mxu2 %v2226_v17 }
 0x528   : > { %s1997_s1 = scalar_lea.hbm %s3280_s20, %s2204_s22 }
 0x529   : > { %s2001_s4 = sshll.u32 %s1997_s1, 4  ;;  %s2483_s1 = scalar_lea.hbm %s3280_s20, 32  ;;  %s2002_s4 = int_to_ptr.hbm [resolvable:$true] %s2001_s4 }
 0x52a   : > { %s2477_s12 = sshra.s32 %s2002_s4, 4  ;;  %s2478_s12 = int_to_ptr.hbm [resolvable:$true] %s2477_s12 }
 0x52b   : > { %1973 = vmatpush.bf16.msrb.mxu2 %v2225_v21  ;;  %s2479_s13 = scalar_lea.hbm %s2478_s12, 8  ;;  %p2484_p7 = scmp.lt.s32.totalorder %s2478_s12, %s3280_s20 }
 0x52c   : > { %p2480_p4 = scmp.ne.s32.totalorder %s2478_s12, %s2479_s13  ;;  %p2485_p9 = scmp.lt.s32.totalorder %s2483_s1, %s2479_s13 }
 0x52e   : > { %p2481_p5 = pnand %p2480_p4, %p2701_p3  ;;  %p2486_p10 = por %p2485_p9, %p2484_p7 }
 0x52f   : > { %1974 = vmatpush.bf16.msrb.mxu2 %v2224_v25 }
 0x530   : > { %p2482_p6 = pneg %p2481_p5 }
 0x532   : > { %p2487_p11 = pnand %p2486_p10, %p2482_p6 }
 0x533   : > { %1975 = vmatpush.bf16.msrb.mxu2 %v2223_v30 }
 0x537   : > { %1976 = vmatpush.bf16.msrb.mxu2 %v2222_v33 }
 0x57d   : > { %v1745_v39 = vpop.permute.xlu2 %1744 }
 0x57e   : > { %v1755_v40 = vsel %vm1395_vm10, %v1736_v34, %v1745_v39 }
 0x591   : > { %v1749_v41 = vpop.permute.xlu0 %1748 }
 0x592   : > { %v1756_v42 = vsel %vm1487_vm11, %v1755_v40, %v1749_v41 }
 0x593   : > { %v1753_v43 = vpop.permute.xlu1 %1752 }
 0x594   : > { %v1758_v44 = vsel %vm1757_vm13, %v1756_v42, %v1753_v43 }
 0x595   : > { %v1759_v45 = vpack.c.bf16 %v1758_v44, %v1758_v44 }
 0x597   : > { %2160 = vmatmul.msk.bf16.vlgmr.msra.gmra.mxu0 %vm1780_vm14, %v1759_v45 }
 0x614   : > { %v1793_v35 = vpop.f32.mrf.mxu0 }
 0x615   : > { %v1794_v5 = vadd.f32 %v2404_v14, %v1793_v35 }
 0x617   : > { %v3139_v26 = vadd.f32 %v1794_v5, %v1373_v46 }
 0x619   : > { %v1800_v47 = vsel %vm1780_vm14, %v3139_v26, 0.0 }
 0x61a   : > { %1801 = vadd.xlane.f32.xlu2 %v1800_v47 }
 0x61c   : > { %v1795_v48 = vpop.f32.mrf.mxu0 }
 0x61d   : > { %v2578_v48 = vmov -1.0  }
 0x68d   : > { %v1802_v55 = vpop.xlane.xlu2 %1801 }
 0x68e   : > { %v1810_v52 = vmul.f32 %v1809_v54, %v1802_v55 }
 0x690   : > { %v1811_v11 = vsub.f32 %v3139_v26, %v1810_v52 }
 0x692   : > { %v1812_v56 = vmul.f32 %v1811_v11, %v1811_v11 }
 0x694   : > { %v1813_v57 = vsel %vm1780_vm14, %v1812_v56, 0.0 }
 0x695   : > { %1814 = vadd.xlane.f32.xlu0 %v1813_v57 }
 0x708   : > { %v1815_v59 = vpop.xlane.xlu0 %1814 }
 0x709   : > { %v1816_v60 = vmul.f32 %v1815_v59, %v1809_v54  ;;  %v2408_v54 = vld [vmem:[%s3278_s16] ss:$0 sm:$0xff] }
 0x70b   : > { %v1817_v61 = vadd.f32 1e-05, %v1816_v60 }
 0x70d   : > { %2427 = vrsqrt.f32 %v1817_v61  ;;  %vm1824_vm1 = vweird.f32 %v1817_v61 }
 0x713   : > { %v2428_v13 = vpop.eup %2427 }
 0x714   : > { %v1819_v62 = vmul.f32 %v2428_v13, %v1817_v61  ;;  %vm1825_vm0 = vweird.f32 %v2428_v13 }
 0x715   : > { %vm1826_vm2 = vmor %vm1824_vm1, %vm1825_vm0 }
 0x716   : > { %v1820_v20 = vmul.f32 %v2428_v13, %v1819_v62 }
 0x718   : > { %v1821_v50 = vmul.f32 0.5, %v1820_v20 }
 0x71a   : > { %v1822_v2 = vsub.f32 1.5, %v1821_v50 }
 0x71c   : > { %v1823_v4 = vmul.f32 %v2428_v13, %v1822_v2 }
 0x71e   : > { %v1827_v63 = vsel %vm1826_vm2, %v2428_v13, %v1823_v4 }
 0x71f   : > { %v1828_v19 = vmul.f32 %v1827_v63, %v1811_v11 }
 0x721   : > { %v1832_v8 = vmul.f32 %v2405_v6, %v1828_v19 }
 0x723   : > { %v1836_v9 = vadd.f32 %v2406_v7, %v1832_v8 }
 0x725   : > { %v1837_v10 = vpack.c.bf16 %v1836_v9, %v1836_v9 }
 0x727   : > { %2169 = vmatmul.msk.bf16.vlgmr.msra.gmra.mxu1 %vm1780_vm14, %v1837_v10 }
 0x7a4   : > { %v1870_v32 = vpop.f32.mrf.mxu1 }
 0x7a5   : > { %v1871_v22 = vadd.f32 %v2407_v18, %v1870_v32 }
 0x7a7   : > { %v1875_v24 = vmul.f32 0.70710677, %v1871_v22  ;;  %v1874_v3 = vmul.f32 0.5, %v1871_v22 }
 0x7a9   : > { %v1878_v27 = vand.u32 2147483647, %v1875_v24  ;;  %vm1876_vm3 = vcmp.ge.f32.partialorder %v1875_v24, 0.0 }
 0x7aa   : > { %v1877_v1 = vsel %vm1876_vm3, 1.0, %v2578_v48 }
 0x7ab   : > { %v1879_v28 = vmul.f32 0.3275911, %v1878_v27  ;;  %v1891_v36 = vsub.f32 0.0, %v1878_v27 }
 0x7ac   : > { %v1872_v29 = vpop.f32.mrf.mxu1 }
 0x7ad   : > { %v1880_v31 = vadd.f32 1.0, %v1879_v28  ;;  %v1892_v39 = vmul.f32 %v1891_v36, %v1878_v27 }
 0x7af   : > { %2429 = vrcp.f32 %v1880_v31  ;;  %v1893_v42 = vmul.f32 1.442695, %v1892_v39 }
 0x7b1   : > { %2431 = vpow2.f32 %v1893_v42 }
 0x7b5   : > { %v2430_v34 = vpop.eup %2429 }
 0x7b6   : > { %v1882_v37 = vmul.f32 1.0614054, %v2430_v34 }
 0x7b7   : > { %v2432_v35 = vpop.eup %2431 }
 0x7b8   : > { %v1883_v38 = vadd.f32 -1.4531521, %v1882_v37 }
 0x7ba   : > { %v1884_v40 = vmul.f32 %v2430_v34, %v1883_v38 }
 0x7bc   : > { %v1885_v41 = vadd.f32 1.4214138, %v1884_v40 }
 0x7be   : > { %v1886_v43 = vmul.f32 %v2430_v34, %v1885_v41 }
 0x7c0   : > { %v1887_v44 = vadd.f32 -0.28449672, %v1886_v43 }
 0x7c2   : > { %v1888_v45 = vmul.f32 %v2430_v34, %v1887_v44 }
 0x7c4   : > { %v1889_v14 = vadd.f32 0.2548296, %v1888_v45 }
 0x7c6   : > { %v1890_v46 = vmul.f32 %v2430_v34, %v1889_v14 }
 0x7c8   : > { %v1895_v5 = vmul.f32 %v2432_v35, %v1890_v46 }
 0x7ca   : > { %v1896_v47 = vsub.f32 1.0, %v1895_v5 }
 0x7cc   : > { %v1897_v49 = vmul.f32 %v1896_v47, %v1877_v1 }
 0x7ce   : > { %v1898_v51 = vadd.f32 1.0, %v1897_v49 }
 0x7d0   : > { %v1899_v53 = vmul.f32 %v1898_v51, %v1874_v3 }
 0x7d2   : > { %v1900_v23 = vpack.c.bf16 %v1899_v53, %v1899_v53 }
 0x7d4   : > { %1977 = vmatmul.bf16.vlgmr.msrb.gmra.mxu2 %v1900_v23 }
 0x857   : > { %v1978_v55 = vpop.f32.mrf.mxu2 }
 0x858   : > { %v1979_v52 = vadd.f32 %v2408_v54, %v1978_v55 }
 0x85a   : > { %v1982_v11 = vadd.f32 %v1979_v52, %v3139_v26 }
 0x85c   : > { %1983 = vst.msk [vmem:[%s3282_s28] sm:$0xff] %vm1780_vm14, %v1982_v11 }
 0x85d   : > { %2490 = shalt.err (!%p2487_p11)
}
 0x85e   : > { %2234 = dma.vmem_to_hbm [thread:$0]  (%p2701_p3), %s2000_s3, 128, %s2002_s4, %s1985_s21  }
 0x85f   : > { %v1980_v26 = vpop.f32.mrf.mxu2 }
 0x860 PF: > { %s3284_s30 = sld [smem:[#allocation11_spill]]  ;;  %p2246_p12 = scmp.ge.s32.totalorder %s2561_s15, 2 }
 0x862   : > { %p2241_p13 = pnand %p2246_p12, %p2710_p8 }
 0x864   : > { %p2242_p0 = pneg %p2241_p13 }
 0x866   : > { %s2013_s0 = sand.u32 1, %s3284_s30  }
 0x867   : > { %s2014_s24 = scalar_lea.sflag [#allocation7], %s2013_s0 }
 0x868   : > { %2528 = dma.done.wait (%p2242_p0), %s2014_s24, 128  }
 0x869   : > { %2530 = vsyncadd (%p2242_p0), %s2014_s24, 4294967168  ;;  %s27_s15 = sadd.s32 1, %s2561_s15   ;;  %s3285_s28 = sld [smem:[#allocation12_spill]] }
 0x86a   : > { %p24_p1 = scmp.ge.s32.totalorder %s27_s15, 6   ;;  %s3286_s30 = sld [smem:[#allocation13_spill]] }
 0x86b   : > { %s3287_s25 = smov %s2537_s26  ;;  %s3288_s26 = smov %s2541_s27 }
 0x86c   : > { %s3289_s27 = smov %s2721_s17  ;;  %s3290_s29 = smov %s2557_s14 }
 0x86d   : > { %s3291_s14 = smov %s3297_s19  ;;  %26 = sbr.rel (!%p24_p1) target bundleno = 14 (0xe), region = 118 }
 0x872   :  { %2020 = vsyncpa [#allocation6], 1 }
 0x873   :  { %2022 = vsyncpa [#allocation6 + $0x1], 1 }
 0x874   :  { %2023 = vsyncpa [#allocation7], 1 }
 0x875   :  { %2025 = vsyncpa [#allocation7 + $0x1], 1 }

</bundles_post_ra>
